<compile_context>
chip_gen: v5e
topology: v5e:2x2
jax: 0.10.0
libtpu: 0.0.40
codegen_flags: <defaults>
</compile_context>

<pallas_src>
import functools

import jax
import jax.numpy as jnp
import numpy as np
from jax.experimental import pallas as pl
from jax.experimental.pallas import tpu as pltpu

EPS = 1e-5       # nn.BatchNorm2d default
KSIZE = 3        # 3x3 convs, padding 1


# -----------------------------------------------------------------------------
# In-kernel helpers: 3x3 conv as 9 accumulated tap-matmuls (MXU, f32 accumulate)
# -----------------------------------------------------------------------------
def _conv3x3_from_phases(xph_ref, w_ref, *, stride, H1, W1):
    """xph_ref: (1, s*s, H1+m, W1+m, Cin) phase-split padded input (bf16).
    w_ref:   (9, Cin, Cout) BN-folded weights, tap-major [dy*3+dx].
    returns  (H1*W1, Cout) float32."""
    acc = None
    for dy in range(KSIZE):
        for dx in range(KSIZE):
            pidx = (dy % stride) * stride + (dx % stride)
            oy, ox = dy // stride, dx // stride
            tap = xph_ref[0, pidx, oy:oy + H1, ox:ox + W1, :]
            tap = tap.reshape(H1 * W1, tap.shape[-1])
            part = jnp.dot(tap, w_ref[dy * KSIZE + dx],
                           preferred_element_type=jnp.float32)
            acc = part if acc is None else acc + part
    return acc


def _conv3x3_from_scratch(y_ref, w_ref, *, H1, W1):
    """Stride-1 3x3 conv over the VMEM-resident padded activation (H1+2, W1+2, C)."""
    acc = None
    for dy in range(KSIZE):
        for dx in range(KSIZE):
            tap = y_ref[dy:dy + H1, dx:dx + W1, :]
            tap = tap.reshape(H1 * W1, tap.shape[-1])
            part = jnp.dot(tap, w_ref[dy * KSIZE + dx],
                           preferred_element_type=jnp.float32)
            acc = part if acc is None else acc + part
    return acc


# -----------------------------------------------------------------------------
# Fused residual-block kernel (one grid step == one sample, full spatial extent)
# -----------------------------------------------------------------------------
def _resblock_kernel(xph_ref, w1_ref, b1_ref, w2_ref, b2_ref, *rest,
                     stride, downsample):
    if downsample:
        wd_ref, bd_ref, out_ref, y1_ref = rest
    else:
        out_ref, y1_ref = rest

    H1, W1, Cout = out_ref.shape[1], out_ref.shape[2], out_ref.shape[3]
    M = H1 * W1

    # ---- conv1 (3x3, stride) + BN1 (shift only) + ReLU -> padded VMEM scratch
    y1 = _conv3x3_from_phases(xph_ref, w1_ref, stride=stride, H1=H1, W1=W1)
    y1 = jnp.maximum(y1 + b1_ref[...], 0.0)
    y1_ref[...] = jnp.zeros(y1_ref.shape, y1_ref.dtype)            # zero halo
    y1_ref[1:H1 + 1, 1:W1 + 1, :] = y1.reshape(H1, W1, Cout).astype(y1_ref.dtype)

    # ---- residual branch ----------------------------------------------------
    # Both the 1x1/stride-s conv and the identity read padded-input positions
    # (1 + s*i, 1 + s*j), i.e. tap (dy, dx) = (1, 1).
    pidx = (1 % stride) * stride + (1 % stride)
    o = 1 // stride
    xres = xph_ref[0, pidx, o:o + H1, o:o + W1, :]
    xres = xres.reshape(M, xres.shape[-1])
    if downsample:
        res = jnp.dot(xres, wd_ref[...], preferred_element_type=jnp.float32)
        res = res + bd_ref[...]
    else:
        res = xres.astype(jnp.float32)     # identity (requires Cin == Cout)

    # ---- conv2 (3x3, stride 1) + BN2 (shift) + residual add + ReLU ----------
    y2 = _conv3x3_from_scratch(y1_ref, w2_ref, H1=H1, W1=W1)
    out = jnp.maximum(y2 + b2_ref[...] + res, 0.0)
    out_ref[0] = out.reshape(H1, W1, Cout).astype(out_ref.dtype)


# -----------------------------------------------------------------------------
# Host-side glue: BN folding, weight layout, phase-stack construction
# -----------------------------------------------------------------------------
def _fold_bn(gamma, beta, mean, var):
    scale = gamma / jnp.sqrt(var + EPS)
    return scale, beta - mean * scale


def _fold_conv3x3(w_oihw, gamma, beta, mean, var, dtype):
    """(Cout, Cin, 3, 3) -> tap-major (9, Cin, Cout) with BN scale folded in."""
    scale, shift = _fold_bn(gamma, beta, mean, var)
    w = w_oihw * scale[:, None, None, None]
    w = jnp.transpose(w, (2, 3, 1, 0)).reshape(9, w_oihw.shape[1], w_oihw.shape[0])
    return w.astype(dtype), shift.reshape(1, -1).astype(jnp.float32)


def _fold_conv1x1(w_oihw, gamma, beta, mean, var, dtype):
    scale, shift = _fold_bn(gamma, beta, mean, var)
    w = (w_oihw[:, :, 0, 0] * scale[:, None]).T          # (Cin, Cout)
    return w.astype(dtype), shift.reshape(1, -1).astype(jnp.float32)


def _phase_stack(x_nhwc, stride, dtype):
    """Pad by 1 and split into stride*stride spatial phases so every 3x3 tap at
    the given stride is a contiguous slice of one phase (~1x input bytes,
    replaces the 9x im2col expansion)."""
    N, H, W, C = x_nhwc.shape
    xp = jnp.pad(x_nhwc, ((0, 0), (1, 1), (1, 1), (0, 0)))
    H1 = (H + 2 - KSIZE) // stride + 1
    W1 = (W + 2 - KSIZE) // stride + 1
    m = (KSIZE - 1) // stride                    # max tap offset inside a phase
    phases = []
    for p in range(stride):
        for q in range(stride):
            ph = xp[:, p::stride, q::stride, :][:, :H1 + m, :W1 + m, :]
            ph = jnp.pad(ph, ((0, 0),
                              (0, H1 + m - ph.shape[1]),
                              (0, W1 + m - ph.shape[2]),
                              (0, 0)))
            phases.append(ph)
    return jnp.stack(phases, axis=1).astype(dtype), H1, W1


# -----------------------------------------------------------------------------
# ResidualBlock forward (Pallas), NCHW in / NCHW out (matches nn.Module)
# -----------------------------------------------------------------------------
def residual_block_pallas(x_nchw, params, *, stride, downsample,
                          compute_dtype=jnp.bfloat16):
    x = jnp.transpose(x_nchw, (0, 2, 3, 1))                   # NHWC
    N, H, W, Cin = x.shape
    Cout = params["w1"].shape[0]
    if not downsample:
        assert stride == 1 and Cin == Cout, \
            "identity shortcut requires stride == 1 and Cin == Cout"

    xph, H1, W1 = _phase_stack(x, stride, compute_dtype)

    w1, b1 = _fold_conv3x3(params["w1"], params["g1"], params["b1"],
                           params["m1"], params["v1"], compute_dtype)
    w2, b2 = _fold_conv3x3(params["w2"], params["g2"], params["b2"],
                           params["m2"], params["v2"], compute_dtype)

    def bcast(shape):
        return pl.BlockSpec(shape, lambda n, _s=len(shape): (0,) * _s)

    in_specs = [
        pl.BlockSpec((1,) + xph.shape[1:], lambda n: (n, 0, 0, 0, 0)),
        bcast(w1.shape), bcast(b1.shape),
        bcast(w2.shape), bcast(b2.shape),
    ]
    args = [xph, w1, b1, w2, b2]
    flops = 2 * N * H1 * W1 * (9 * Cin * Cout + 9 * Cout * Cout)
    if downsample:
        wd, bd = _fold_conv1x1(params["wd"], params["gd"], params["bd"],
                               params["md"], params["vd"], compute_dtype)
        in_specs += [bcast(wd.shape), bcast(bd.shape)]
        args += [wd, bd]
        flops += 2 * N * H1 * W1 * Cin * Cout

    bytes_accessed = int(sum(a.size * a.dtype.itemsize for a in args)
                         + N * H1 * W1 * Cout * 4)

    kernel = functools.partial(_resblock_kernel, stride=stride,
                               downsample=downsample)
    out = pl.pallas_call(
        kernel,
        out_shape=jax.ShapeDtypeStruct((N, H1, W1, Cout), jnp.float32),
        grid_spec=pltpu.PrefetchScalarGridSpec(
            num_scalar_prefetch=0,
            grid=(N,),
            in_specs=in_specs,
            out_specs=pl.BlockSpec((1, H1, W1, Cout), lambda n: (n, 0, 0, 0)),
            scratch_shapes=[pltpu.VMEM((H1 + 2, W1 + 2, Cout), compute_dtype)],
        ),
        compiler_params=pltpu.CompilerParams(
            dimension_semantics=("parallel",),       # batch split across cores
            vmem_limit_bytes=32 * 1024 * 1024,       # safe on v5e/v6e/v7x
        ),
        cost_estimate=pl.CostEstimate(flops=flops, transcendentals=0,
                                      bytes_accessed=bytes_accessed),
    )(*args)
    return jnp.transpose(out, (0, 3, 1, 2))                   # back to NCHW


# -----------------------------------------------------------------------------
# Pure-JAX reference (lax.conv) for correctness check
# -----------------------------------------------------------------------------
def _conv_ref(x, w, stride, pad):
    return jax.lax.conv_general_dilated(
        x, w, (stride, stride), [(pad, pad), (pad, pad)],
        dimension_numbers=("NCHW", "OIHW", "NCHW"))


def _bn_ref(x, g, b, m, v):
    rs = lambda t: t.reshape(1, -1, 1, 1)
    return (x - rs(m)) / jnp.sqrt(rs(v) + EPS) * rs(g) + rs(b)


def residual_block_ref(x, p, *, stride, downsample):
    y = _conv_ref(x, p["w1"], stride, 1)
    y = jnp.maximum(_bn_ref(y, p["g1"], p["b1"], p["m1"], p["v1"]), 0.0)
    y = _conv_ref(y, p["w2"], 1, 1)
    y = _bn_ref(y, p["g2"], p["b2"], p["m2"], p["v2"])
    if downsample:
        r = _conv_ref(x, p["wd"], stride, 0)
        r = _bn_ref(r, p["gd"], p["bd"], p["md"], p["vd"])
    else:
        r = x
    return jnp.maximum(y + r, 0.0)


# -----------------------------------------------------------------------------
if __name__ == "__main__":
    key = jax.random.PRNGKey(0)

    def make_params(k, cin, cout, with_downsample):
        ks = jax.random.split(k, 16)
        u = lambda kk, s: jax.random.uniform(kk, s, jnp.float32, 0.5, 1.5)
        n = lambda kk, s: 0.1 * jax.random.normal(kk, s, jnp.float32)
        p = {
            "w1": n(ks[0], (cout, cin, 3, 3)),
            "g1": u(ks[1], (cout,)), "b1": n(ks[2], (cout,)),
            "m1": n(ks[3], (cout,)), "v1": u(ks[4], (cout,)),
            "w2": n(ks[5], (cout, cout, 3, 3)),
            "g2": u(ks[6], (cout,)), "b2": n(ks[7], (cout,)),
            "m2": n(ks[8], (cout,)), "v2": u(ks[9], (cout,)),
        }
        if with_downsample:
            p.update({
                "wd": n(ks[10], (cout, cin, 1, 1)),
                "gd": u(ks[11], (cout,)), "bd": n(ks[12], (cout,)),
                "md": n(ks[13], (cout,)), "vd": u(ks[14], (cout,)),
            })
        return p

    k0, k1, k2 = jax.random.split(key, 3)
    N, Cin, Cmid, H, W = 2, 4, 8, 16, 16
    x = jax.random.normal(k2, (N, Cin, H, W), jnp.float32)

    rb = jax.jit(residual_block_pallas, static_argnames=("stride", "downsample"))

    # Block A: 4 -> 8 channels, stride 2, 1x1-conv/BN downsample shortcut
    pA = make_params(k0, Cin, Cmid, True)
    outA = jax.block_until_ready(rb(x, pA, stride=2, downsample=True))
    refA = jax.block_until_ready(residual_block_ref(x, pA, stride=2, downsample=True))
    assert outA.shape == refA.shape == (N, Cmid, H // 2, W // 2)
    np.testing.assert_allclose(np.asarray(outA), np.asarray(refA),
                               rtol=2e-2, atol=3e-2)

    # Block B: 8 -> 8 channels, stride 1, identity shortcut (chained on block A)
    pB = make_params(k1, Cmid, Cmid, False)
    outB = jax.block_until_ready(rb(outA, pB, stride=1, downsample=False))
    refB = jax.block_until_ready(residual_block_ref(outA, pB, stride=1, downsample=False))
    assert outB.shape == (N, Cmid, H // 2, W // 2)
    np.testing.assert_allclose(np.asarray(outB), np.asarray(refB),
                               rtol=2e-2, atol=3e-2)

    print("KERNEL_OK")
</pallas_src>

<mosaic_0001>
module attributes {stable_mosaic.version = 11 : i64} {
  func.func @_resblock_kernel(%arg0: i32, %arg1: memref<1x4x9x9x4xbf16, #tpu.memory_space<vmem>>, %arg2: memref<9x4x8xbf16, #tpu.memory_space<vmem>>, %arg3: memref<1x8xf32, #tpu.memory_space<vmem>>, %arg4: memref<9x8x8xbf16, #tpu.memory_space<vmem>>, %arg5: memref<1x8xf32, #tpu.memory_space<vmem>>, %arg6: memref<4x8xbf16, #tpu.memory_space<vmem>>, %arg7: memref<1x8xf32, #tpu.memory_space<vmem>>, %arg8: memref<1x8x8x8xf32, #tpu.memory_space<vmem>>, %arg9: memref<10x10x8xbf16, #tpu.memory_space<vmem>>) attributes {dimension_semantics = [#tpu.dimension_semantics<parallel>], iteration_bounds = array<i64: 2>, scalar_prefetch = 0 : i64, scratch_operands = 1 : i64, tpu.core_type = #tpu.core_type<tc>, window_params = [{transform_indices = @transform_0, window_bounds = array<i64: 1, 4, 9, 9, 4>}, {pipeline_mode = #tpu.pipeline_mode<synchronous>, transform_indices = @transform_1, window_bounds = array<i64: 9, 4, 8>}, {pipeline_mode = #tpu.pipeline_mode<synchronous>, transform_indices = @transform_2, window_bounds = array<i64: 1, 8>}, {pipeline_mode = #tpu.pipeline_mode<synchronous>, transform_indices = @transform_3, window_bounds = array<i64: 9, 8, 8>}, {pipeline_mode = #tpu.pipeline_mode<synchronous>, transform_indices = @transform_4, window_bounds = array<i64: 1, 8>}, {pipeline_mode = #tpu.pipeline_mode<synchronous>, transform_indices = @transform_5, window_bounds = array<i64: 4, 8>}, {pipeline_mode = #tpu.pipeline_mode<synchronous>, transform_indices = @transform_6, window_bounds = array<i64: 1, 8>}, {transform_indices = @transform_7, window_bounds = array<i64: 1, 8, 8, 8>}]} {
    %c0 = arith.constant 0 : index
    %c0_0 = arith.constant 0 : index
    %c0_1 = arith.constant 0 : index
    %c0_2 = arith.constant 0 : index
    %c0_3 = arith.constant 0 : index
    %0 = vector.load %arg1[%c0, %c0_0, %c0_1, %c0_2, %c0_3] : memref<1x4x9x9x4xbf16, #tpu.memory_space<vmem>>, vector<1x1x8x8x4xbf16>
    %1 = vector.shape_cast %0 : vector<1x1x8x8x4xbf16> to vector<8x8x4xbf16>
    %2 = vector.shape_cast %1 : vector<8x8x4xbf16> to vector<64x4xbf16>
    %c0_4 = arith.constant 0 : index
    %c0_5 = arith.constant 0 : index
    %c0_6 = arith.constant 0 : index
    %3 = vector.load %arg2[%c0_4, %c0_5, %c0_6] : memref<9x4x8xbf16, #tpu.memory_space<vmem>>, vector<1x4x8xbf16>
    %4 = vector.shape_cast %3 : vector<1x4x8xbf16> to vector<4x8xbf16>
    %cst = arith.constant dense<0.000000e+00> : vector<64x8xf32>
    %5 = tpu.matmul %2, %4, %cst {dimension_numbers = #tpu.dot_dimension_numbers<[1], [0], [0], [1], [0, 0, 1, 1], [], []>} : vector<64x4xbf16>, vector<4x8xbf16>, vector<64x8xf32> -> vector<64x8xf32>
    %c0_7 = arith.constant 0 : index
    %c1 = arith.constant 1 : index
    %c0_8 = arith.constant 0 : index
    %c0_9 = arith.constant 0 : index
    %c0_10 = arith.constant 0 : index
    %6 = vector.load %arg1[%c0_7, %c1, %c0_8, %c0_9, %c0_10] : memref<1x4x9x9x4xbf16, #tpu.memory_space<vmem>>, vector<1x1x8x8x4xbf16>
    %7 = vector.shape_cast %6 : vector<1x1x8x8x4xbf16> to vector<8x8x4xbf16>
    %8 = vector.shape_cast %7 : vector<8x8x4xbf16> to vector<64x4xbf16>
    %c1_11 = arith.constant 1 : index
    %c0_12 = arith.constant 0 : index
    %c0_13 = arith.constant 0 : index
    %9 = vector.load %arg2[%c1_11, %c0_12, %c0_13] : memref<9x4x8xbf16, #tpu.memory_space<vmem>>, vector<1x4x8xbf16>
    %10 = vector.shape_cast %9 : vector<1x4x8xbf16> to vector<4x8xbf16>
    %cst_14 = arith.constant dense<0.000000e+00> : vector<64x8xf32>
    %11 = tpu.matmul %8, %10, %cst_14 {dimension_numbers = #tpu.dot_dimension_numbers<[1], [0], [0], [1], [0, 0, 1, 1], [], []>} : vector<64x4xbf16>, vector<4x8xbf16>, vector<64x8xf32> -> vector<64x8xf32>
    %12 = arith.addf %5, %11 : vector<64x8xf32>
    %c0_15 = arith.constant 0 : index
    %c0_16 = arith.constant 0 : index
    %c0_17 = arith.constant 0 : index
    %c1_18 = arith.constant 1 : index
    %c0_19 = arith.constant 0 : index
    %13 = vector.load %arg1[%c0_15, %c0_16, %c0_17, %c1_18, %c0_19] : memref<1x4x9x9x4xbf16, #tpu.memory_space<vmem>>, vector<1x1x8x8x4xbf16>
    %14 = vector.shape_cast %13 : vector<1x1x8x8x4xbf16> to vector<8x8x4xbf16>
    %15 = vector.shape_cast %14 : vector<8x8x4xbf16> to vector<64x4xbf16>
    %c2 = arith.constant 2 : index
    %c0_20 = arith.constant 0 : index
    %c0_21 = arith.constant 0 : index
    %16 = vector.load %arg2[%c2, %c0_20, %c0_21] : memref<9x4x8xbf16, #tpu.memory_space<vmem>>, vector<1x4x8xbf16>
    %17 = vector.shape_cast %16 : vector<1x4x8xbf16> to vector<4x8xbf16>
    %cst_22 = arith.constant dense<0.000000e+00> : vector<64x8xf32>
    %18 = tpu.matmul %15, %17, %cst_22 {dimension_numbers = #tpu.dot_dimension_numbers<[1], [0], [0], [1], [0, 0, 1, 1], [], []>} : vector<64x4xbf16>, vector<4x8xbf16>, vector<64x8xf32> -> vector<64x8xf32>
    %19 = arith.addf %12, %18 : vector<64x8xf32>
    %c0_23 = arith.constant 0 : index
    %c2_24 = arith.constant 2 : index
    %c0_25 = arith.constant 0 : index
    %c0_26 = arith.constant 0 : index
    %c0_27 = arith.constant 0 : index
    %20 = vector.load %arg1[%c0_23, %c2_24, %c0_25, %c0_26, %c0_27] : memref<1x4x9x9x4xbf16, #tpu.memory_space<vmem>>, vector<1x1x8x8x4xbf16>
    %21 = vector.shape_cast %20 : vector<1x1x8x8x4xbf16> to vector<8x8x4xbf16>
    %22 = vector.shape_cast %21 : vector<8x8x4xbf16> to vector<64x4xbf16>
    %c3 = arith.constant 3 : index
    %c0_28 = arith.constant 0 : index
    %c0_29 = arith.constant 0 : index
    %23 = vector.load %arg2[%c3, %c0_28, %c0_29] : memref<9x4x8xbf16, #tpu.memory_space<vmem>>, vector<1x4x8xbf16>
    %24 = vector.shape_cast %23 : vector<1x4x8xbf16> to vector<4x8xbf16>
    %cst_30 = arith.constant dense<0.000000e+00> : vector<64x8xf32>
    %25 = tpu.matmul %22, %24, %cst_30 {dimension_numbers = #tpu.dot_dimension_numbers<[1], [0], [0], [1], [0, 0, 1, 1], [], []>} : vector<64x4xbf16>, vector<4x8xbf16>, vector<64x8xf32> -> vector<64x8xf32>
    %26 = arith.addf %19, %25 : vector<64x8xf32>
    %c0_31 = arith.constant 0 : index
    %c3_32 = arith.constant 3 : index
    %c0_33 = arith.constant 0 : index
    %c0_34 = arith.constant 0 : index
    %c0_35 = arith.constant 0 : index
    %27 = vector.load %arg1[%c0_31, %c3_32, %c0_33, %c0_34, %c0_35] : memref<1x4x9x9x4xbf16, #tpu.memory_space<vmem>>, vector<1x1x8x8x4xbf16>
    %28 = vector.shape_cast %27 : vector<1x1x8x8x4xbf16> to vector<8x8x4xbf16>
    %29 = vector.shape_cast %28 : vector<8x8x4xbf16> to vector<64x4xbf16>
    %c4 = arith.constant 4 : index
    %c0_36 = arith.constant 0 : index
    %c0_37 = arith.constant 0 : index
    %30 = vector.load %arg2[%c4, %c0_36, %c0_37] : memref<9x4x8xbf16, #tpu.memory_space<vmem>>, vector<1x4x8xbf16>
    %31 = vector.shape_cast %30 : vector<1x4x8xbf16> to vector<4x8xbf16>
    %cst_38 = arith.constant dense<0.000000e+00> : vector<64x8xf32>
    %32 = tpu.matmul %29, %31, %cst_38 {dimension_numbers = #tpu.dot_dimension_numbers<[1], [0], [0], [1], [0, 0, 1, 1], [], []>} : vector<64x4xbf16>, vector<4x8xbf16>, vector<64x8xf32> -> vector<64x8xf32>
    %33 = arith.addf %26, %32 : vector<64x8xf32>
    %c0_39 = arith.constant 0 : index
    %c2_40 = arith.constant 2 : index
    %c0_41 = arith.constant 0 : index
    %c1_42 = arith.constant 1 : index
    %c0_43 = arith.constant 0 : index
    %34 = vector.load %arg1[%c0_39, %c2_40, %c0_41, %c1_42, %c0_43] : memref<1x4x9x9x4xbf16, #tpu.memory_space<vmem>>, vector<1x1x8x8x4xbf16>
    %35 = vector.shape_cast %34 : vector<1x1x8x8x4xbf16> to vector<8x8x4xbf16>
    %36 = vector.shape_cast %35 : vector<8x8x4xbf16> to vector<64x4xbf16>
    %c5 = arith.constant 5 : index
    %c0_44 = arith.constant 0 : index
    %c0_45 = arith.constant 0 : index
    %37 = vector.load %arg2[%c5, %c0_44, %c0_45] : memref<9x4x8xbf16, #tpu.memory_space<vmem>>, vector<1x4x8xbf16>
    %38 = vector.shape_cast %37 : vector<1x4x8xbf16> to vector<4x8xbf16>
    %cst_46 = arith.constant dense<0.000000e+00> : vector<64x8xf32>
    %39 = tpu.matmul %36, %38, %cst_46 {dimension_numbers = #tpu.dot_dimension_numbers<[1], [0], [0], [1], [0, 0, 1, 1], [], []>} : vector<64x4xbf16>, vector<4x8xbf16>, vector<64x8xf32> -> vector<64x8xf32>
    %40 = arith.addf %33, %39 : vector<64x8xf32>
    %c0_47 = arith.constant 0 : index
    %c0_48 = arith.constant 0 : index
    %c1_49 = arith.constant 1 : index
    %c0_50 = arith.constant 0 : index
    %c0_51 = arith.constant 0 : index
    %41 = vector.load %arg1[%c0_47, %c0_48, %c1_49, %c0_50, %c0_51] : memref<1x4x9x9x4xbf16, #tpu.memory_space<vmem>>, vector<1x1x8x8x4xbf16>
    %42 = vector.shape_cast %41 : vector<1x1x8x8x4xbf16> to vector<8x8x4xbf16>
    %43 = vector.shape_cast %42 : vector<8x8x4xbf16> to vector<64x4xbf16>
    %c6 = arith.constant 6 : index
    %c0_52 = arith.constant 0 : index
    %c0_53 = arith.constant 0 : index
    %44 = vector.load %arg2[%c6, %c0_52, %c0_53] : memref<9x4x8xbf16, #tpu.memory_space<vmem>>, vector<1x4x8xbf16>
    %45 = vector.shape_cast %44 : vector<1x4x8xbf16> to vector<4x8xbf16>
    %cst_54 = arith.constant dense<0.000000e+00> : vector<64x8xf32>
    %46 = tpu.matmul %43, %45, %cst_54 {dimension_numbers = #tpu.dot_dimension_numbers<[1], [0], [0], [1], [0, 0, 1, 1], [], []>} : vector<64x4xbf16>, vector<4x8xbf16>, vector<64x8xf32> -> vector<64x8xf32>
    %47 = arith.addf %40, %46 : vector<64x8xf32>
    %c0_55 = arith.constant 0 : index
    %c1_56 = arith.constant 1 : index
    %c1_57 = arith.constant 1 : index
    %c0_58 = arith.constant 0 : index
    %c0_59 = arith.constant 0 : index
    %48 = vector.load %arg1[%c0_55, %c1_56, %c1_57, %c0_58, %c0_59] : memref<1x4x9x9x4xbf16, #tpu.memory_space<vmem>>, vector<1x1x8x8x4xbf16>
    %49 = vector.shape_cast %48 : vector<1x1x8x8x4xbf16> to vector<8x8x4xbf16>
    %50 = vector.shape_cast %49 : vector<8x8x4xbf16> to vector<64x4xbf16>
    %c7 = arith.constant 7 : index
    %c0_60 = arith.constant 0 : index
    %c0_61 = arith.constant 0 : index
    %51 = vector.load %arg2[%c7, %c0_60, %c0_61] : memref<9x4x8xbf16, #tpu.memory_space<vmem>>, vector<1x4x8xbf16>
    %52 = vector.shape_cast %51 : vector<1x4x8xbf16> to vector<4x8xbf16>
    %cst_62 = arith.constant dense<0.000000e+00> : vector<64x8xf32>
    %53 = tpu.matmul %50, %52, %cst_62 {dimension_numbers = #tpu.dot_dimension_numbers<[1], [0], [0], [1], [0, 0, 1, 1], [], []>} : vector<64x4xbf16>, vector<4x8xbf16>, vector<64x8xf32> -> vector<64x8xf32>
    %54 = arith.addf %47, %53 : vector<64x8xf32>
    %c0_63 = arith.constant 0 : index
    %c0_64 = arith.constant 0 : index
    %c1_65 = arith.constant 1 : index
    %c1_66 = arith.constant 1 : index
    %c0_67 = arith.constant 0 : index
    %55 = vector.load %arg1[%c0_63, %c0_64, %c1_65, %c1_66, %c0_67] : memref<1x4x9x9x4xbf16, #tpu.memory_space<vmem>>, vector<1x1x8x8x4xbf16>
    %56 = vector.shape_cast %55 : vector<1x1x8x8x4xbf16> to vector<8x8x4xbf16>
    %57 = vector.shape_cast %56 : vector<8x8x4xbf16> to vector<64x4xbf16>
    %c8 = arith.constant 8 : index
    %c0_68 = arith.constant 0 : index
    %c0_69 = arith.constant 0 : index
    %58 = vector.load %arg2[%c8, %c0_68, %c0_69] : memref<9x4x8xbf16, #tpu.memory_space<vmem>>, vector<1x4x8xbf16>
    %59 = vector.shape_cast %58 : vector<1x4x8xbf16> to vector<4x8xbf16>
    %cst_70 = arith.constant dense<0.000000e+00> : vector<64x8xf32>
    %60 = tpu.matmul %57, %59, %cst_70 {dimension_numbers = #tpu.dot_dimension_numbers<[1], [0], [0], [1], [0, 0, 1, 1], [], []>} : vector<64x4xbf16>, vector<4x8xbf16>, vector<64x8xf32> -> vector<64x8xf32>
    %61 = arith.addf %54, %60 : vector<64x8xf32>
    %c0_71 = arith.constant 0 : index
    %c0_72 = arith.constant 0 : index
    %62 = vector.load %arg3[%c0_71, %c0_72] : memref<1x8xf32, #tpu.memory_space<vmem>>, vector<1x8xf32>
    %63 = vector.broadcast %62 : vector<1x8xf32> to vector<64x8xf32>
    %64 = arith.addf %61, %63 : vector<64x8xf32>
    %cst_73 = arith.constant 0.000000e+00 : f32
    %65 = vector.broadcast %cst_73 : f32 to vector<64x8xf32>
    %66 = arith.maximumf %64, %65 : vector<64x8xf32>
    %cst_74 = arith.constant 0.000000e+00 : bf16
    %67 = vector.broadcast %cst_74 : bf16 to vector<10x10x8xbf16>
    %c0_75 = arith.constant 0 : index
    %c0_76 = arith.constant 0 : index
    %c0_77 = arith.constant 0 : index
    %68 = vector.load %arg9[%c0_75, %c0_76, %c0_77] : memref<10x10x8xbf16, #tpu.memory_space<vmem>>, vector<10x10x8xbf16>
    tpu.vector_store %arg9[%c0_75, %c0_76, %c0_77], %67 {strides = array<i32>} : memref<10x10x8xbf16, #tpu.memory_space<vmem>>, vector<10x10x8xbf16>,
    %69 = vector.shape_cast %66 : vector<64x8xf32> to vector<8x8x8xf32>
    %70 = arith.truncf %69 : vector<8x8x8xf32> to vector<8x8x8xbf16>
    %c1_78 = arith.constant 1 : index
    %c1_79 = arith.constant 1 : index
    %c0_80 = arith.constant 0 : index
    %71 = vector.load %arg9[%c1_78, %c1_79, %c0_80] : memref<10x10x8xbf16, #tpu.memory_space<vmem>>, vector<8x8x8xbf16>
    tpu.vector_store %arg9[%c1_78, %c1_79, %c0_80], %70 {strides = array<i32>} : memref<10x10x8xbf16, #tpu.memory_space<vmem>>, vector<8x8x8xbf16>,
    %c0_81 = arith.constant 0 : index
    %c3_82 = arith.constant 3 : index
    %c0_83 = arith.constant 0 : index
    %c0_84 = arith.constant 0 : index
    %c0_85 = arith.constant 0 : index
    %72 = vector.load %arg1[%c0_81, %c3_82, %c0_83, %c0_84, %c0_85] : memref<1x4x9x9x4xbf16, #tpu.memory_space<vmem>>, vector<1x1x8x8x4xbf16>
    %73 = vector.shape_cast %72 : vector<1x1x8x8x4xbf16> to vector<8x8x4xbf16>
    %74 = vector.shape_cast %73 : vector<8x8x4xbf16> to vector<64x4xbf16>
    %c0_86 = arith.constant 0 : index
    %c0_87 = arith.constant 0 : index
    %75 = vector.load %arg6[%c0_86, %c0_87] : memref<4x8xbf16, #tpu.memory_space<vmem>>, vector<4x8xbf16>
    %cst_88 = arith.constant dense<0.000000e+00> : vector<64x8xf32>
    %76 = tpu.matmul %74, %75, %cst_88 {dimension_numbers = #tpu.dot_dimension_numbers<[1], [0], [0], [1], [0, 0, 1, 1], [], []>} : vector<64x4xbf16>, vector<4x8xbf16>, vector<64x8xf32> -> vector<64x8xf32>
    %c0_89 = arith.constant 0 : index
    %c0_90 = arith.constant 0 : index
    %77 = vector.load %arg7[%c0_89, %c0_90] : memref<1x8xf32, #tpu.memory_space<vmem>>, vector<1x8xf32>
    %78 = vector.broadcast %77 : vector<1x8xf32> to vector<64x8xf32>
    %79 = arith.addf %76, %78 : vector<64x8xf32>
    %c0_91 = arith.constant 0 : index
    %c0_92 = arith.constant 0 : index
    %c0_93 = arith.constant 0 : index
    %80 = vector.load %arg9[%c0_91, %c0_92, %c0_93] : memref<10x10x8xbf16, #tpu.memory_space<vmem>>, vector<8x8x8xbf16>
    %81 = vector.shape_cast %80 : vector<8x8x8xbf16> to vector<64x8xbf16>
    %c0_94 = arith.constant 0 : index
    %c0_95 = arith.constant 0 : index
    %c0_96 = arith.constant 0 : index
    %82 = vector.load %arg4[%c0_94, %c0_95, %c0_96] : memref<9x8x8xbf16, #tpu.memory_space<vmem>>, vector<1x8x8xbf16>
    %83 = vector.shape_cast %82 : vector<1x8x8xbf16> to vector<8x8xbf16>
    %cst_97 = arith.constant dense<0.000000e+00> : vector<64x8xf32>
    %84 = tpu.matmul %81, %83, %cst_97 {dimension_numbers = #tpu.dot_dimension_numbers<[1], [0], [0], [1], [0, 0, 1, 1], [], []>} : vector<64x8xbf16>, vector<8x8xbf16>, vector<64x8xf32> -> vector<64x8xf32>
    %c0_98 = arith.constant 0 : index
    %c1_99 = arith.constant 1 : index
    %c0_100 = arith.constant 0 : index
    %85 = vector.load %arg9[%c0_98, %c1_99, %c0_100] : memref<10x10x8xbf16, #tpu.memory_space<vmem>>, vector<8x8x8xbf16>
    %86 = vector.shape_cast %85 : vector<8x8x8xbf16> to vector<64x8xbf16>
    %c1_101 = arith.constant 1 : index
    %c0_102 = arith.constant 0 : index
    %c0_103 = arith.constant 0 : index
    %87 = vector.load %arg4[%c1_101, %c0_102, %c0_103] : memref<9x8x8xbf16, #tpu.memory_space<vmem>>, vector<1x8x8xbf16>
    %88 = vector.shape_cast %87 : vector<1x8x8xbf16> to vector<8x8xbf16>
    %cst_104 = arith.constant dense<0.000000e+00> : vector<64x8xf32>
    %89 = tpu.matmul %86, %88, %cst_104 {dimension_numbers = #tpu.dot_dimension_numbers<[1], [0], [0], [1], [0, 0, 1, 1], [], []>} : vector<64x8xbf16>, vector<8x8xbf16>, vector<64x8xf32> -> vector<64x8xf32>
    %90 = arith.addf %84, %89 : vector<64x8xf32>
    %c0_105 = arith.constant 0 : index
    %c2_106 = arith.constant 2 : index
    %c0_107 = arith.constant 0 : index
    %91 = vector.load %arg9[%c0_105, %c2_106, %c0_107] : memref<10x10x8xbf16, #tpu.memory_space<vmem>>, vector<8x8x8xbf16>
    %92 = vector.shape_cast %91 : vector<8x8x8xbf16> to vector<64x8xbf16>
    %c2_108 = arith.constant 2 : index
    %c0_109 = arith.constant 0 : index
    %c0_110 = arith.constant 0 : index
    %93 = vector.load %arg4[%c2_108, %c0_109, %c0_110] : memref<9x8x8xbf16, #tpu.memory_space<vmem>>, vector<1x8x8xbf16>
    %94 = vector.shape_cast %93 : vector<1x8x8xbf16> to vector<8x8xbf16>
    %cst_111 = arith.constant dense<0.000000e+00> : vector<64x8xf32>
    %95 = tpu.matmul %92, %94, %cst_111 {dimension_numbers = #tpu.dot_dimension_numbers<[1], [0], [0], [1], [0, 0, 1, 1], [], []>} : vector<64x8xbf16>, vector<8x8xbf16>, vector<64x8xf32> -> vector<64x8xf32>
    %96 = arith.addf %90, %95 : vector<64x8xf32>
    %c1_112 = arith.constant 1 : index
    %c0_113 = arith.constant 0 : index
    %c0_114 = arith.constant 0 : index
    %97 = vector.load %arg9[%c1_112, %c0_113, %c0_114] : memref<10x10x8xbf16, #tpu.memory_space<vmem>>, vector<8x8x8xbf16>
    %98 = vector.shape_cast %97 : vector<8x8x8xbf16> to vector<64x8xbf16>
    %c3_115 = arith.constant 3 : index
    %c0_116 = arith.constant 0 : index
    %c0_117 = arith.constant 0 : index
    %99 = vector.load %arg4[%c3_115, %c0_116, %c0_117] : memref<9x8x8xbf16, #tpu.memory_space<vmem>>, vector<1x8x8xbf16>
    %100 = vector.shape_cast %99 : vector<1x8x8xbf16> to vector<8x8xbf16>
    %cst_118 = arith.constant dense<0.000000e+00> : vector<64x8xf32>
    %101 = tpu.matmul %98, %100, %cst_118 {dimension_numbers = #tpu.dot_dimension_numbers<[1], [0], [0], [1], [0, 0, 1, 1], [], []>} : vector<64x8xbf16>, vector<8x8xbf16>, vector<64x8xf32> -> vector<64x8xf32>
    %102 = arith.addf %96, %101 : vector<64x8xf32>
    %c1_119 = arith.constant 1 : index
    %c1_120 = arith.constant 1 : index
    %c0_121 = arith.constant 0 : index
    %103 = vector.load %arg9[%c1_119, %c1_120, %c0_121] : memref<10x10x8xbf16, #tpu.memory_space<vmem>>, vector<8x8x8xbf16>
    %104 = vector.shape_cast %103 : vector<8x8x8xbf16> to vector<64x8xbf16>
    %c4_122 = arith.constant 4 : index
    %c0_123 = arith.constant 0 : index
    %c0_124 = arith.constant 0 : index
    %105 = vector.load %arg4[%c4_122, %c0_123, %c0_124] : memref<9x8x8xbf16, #tpu.memory_space<vmem>>, vector<1x8x8xbf16>
    %106 = vector.shape_cast %105 : vector<1x8x8xbf16> to vector<8x8xbf16>
    %cst_125 = arith.constant dense<0.000000e+00> : vector<64x8xf32>
    %107 = tpu.matmul %104, %106, %cst_125 {dimension_numbers = #tpu.dot_dimension_numbers<[1], [0], [0], [1], [0, 0, 1, 1], [], []>} : vector<64x8xbf16>, vector<8x8xbf16>, vector<64x8xf32> -> vector<64x8xf32>
    %108 = arith.addf %102, %107 : vector<64x8xf32>
    %c1_126 = arith.constant 1 : index
    %c2_127 = arith.constant 2 : index
    %c0_128 = arith.constant 0 : index
    %109 = vector.load %arg9[%c1_126, %c2_127, %c0_128] : memref<10x10x8xbf16, #tpu.memory_space<vmem>>, vector<8x8x8xbf16>
    %110 = vector.shape_cast %109 : vector<8x8x8xbf16> to vector<64x8xbf16>
    %c5_129 = arith.constant 5 : index
    %c0_130 = arith.constant 0 : index
    %c0_131 = arith.constant 0 : index
    %111 = vector.load %arg4[%c5_129, %c0_130, %c0_131] : memref<9x8x8xbf16, #tpu.memory_space<vmem>>, vector<1x8x8xbf16>
    %112 = vector.shape_cast %111 : vector<1x8x8xbf16> to vector<8x8xbf16>
    %cst_132 = arith.constant dense<0.000000e+00> : vector<64x8xf32>
    %113 = tpu.matmul %110, %112, %cst_132 {dimension_numbers = #tpu.dot_dimension_numbers<[1], [0], [0], [1], [0, 0, 1, 1], [], []>} : vector<64x8xbf16>, vector<8x8xbf16>, vector<64x8xf32> -> vector<64x8xf32>
    %114 = arith.addf %108, %113 : vector<64x8xf32>
    %c2_133 = arith.constant 2 : index
    %c0_134 = arith.constant 0 : index
    %c0_135 = arith.constant 0 : index
    %115 = vector.load %arg9[%c2_133, %c0_134, %c0_135] : memref<10x10x8xbf16, #tpu.memory_space<vmem>>, vector<8x8x8xbf16>
    %116 = vector.shape_cast %115 : vector<8x8x8xbf16> to vector<64x8xbf16>
    %c6_136 = arith.constant 6 : index
    %c0_137 = arith.constant 0 : index
    %c0_138 = arith.constant 0 : index
    %117 = vector.load %arg4[%c6_136, %c0_137, %c0_138] : memref<9x8x8xbf16, #tpu.memory_space<vmem>>, vector<1x8x8xbf16>
    %118 = vector.shape_cast %117 : vector<1x8x8xbf16> to vector<8x8xbf16>
    %cst_139 = arith.constant dense<0.000000e+00> : vector<64x8xf32>
    %119 = tpu.matmul %116, %118, %cst_139 {dimension_numbers = #tpu.dot_dimension_numbers<[1], [0], [0], [1], [0, 0, 1, 1], [], []>} : vector<64x8xbf16>, vector<8x8xbf16>, vector<64x8xf32> -> vector<64x8xf32>
    %120 = arith.addf %114, %119 : vector<64x8xf32>
    %c2_140 = arith.constant 2 : index
    %c1_141 = arith.constant 1 : index
    %c0_142 = arith.constant 0 : index
    %121 = vector.load %arg9[%c2_140, %c1_141, %c0_142] : memref<10x10x8xbf16, #tpu.memory_space<vmem>>, vector<8x8x8xbf16>
    %122 = vector.shape_cast %121 : vector<8x8x8xbf16> to vector<64x8xbf16>
    %c7_143 = arith.constant 7 : index
    %c0_144 = arith.constant 0 : index
    %c0_145 = arith.constant 0 : index
    %123 = vector.load %arg4[%c7_143, %c0_144, %c0_145] : memref<9x8x8xbf16, #tpu.memory_space<vmem>>, vector<1x8x8xbf16>
    %124 = vector.shape_cast %123 : vector<1x8x8xbf16> to vector<8x8xbf16>
    %cst_146 = arith.constant dense<0.000000e+00> : vector<64x8xf32>
    %125 = tpu.matmul %122, %124, %cst_146 {dimension_numbers = #tpu.dot_dimension_numbers<[1], [0], [0], [1], [0, 0, 1, 1], [], []>} : vector<64x8xbf16>, vector<8x8xbf16>, vector<64x8xf32> -> vector<64x8xf32>
    %126 = arith.addf %120, %125 : vector<64x8xf32>
    %c2_147 = arith.constant 2 : index
    %c2_148 = arith.constant 2 : index
    %c0_149 = arith.constant 0 : index
    %127 = vector.load %arg9[%c2_147, %c2_148, %c0_149] : memref<10x10x8xbf16, #tpu.memory_space<vmem>>, vector<8x8x8xbf16>
    %128 = vector.shape_cast %127 : vector<8x8x8xbf16> to vector<64x8xbf16>
    %c8_150 = arith.constant 8 : index
    %c0_151 = arith.constant 0 : index
    %c0_152 = arith.constant 0 : index
    %129 = vector.load %arg4[%c8_150, %c0_151, %c0_152] : memref<9x8x8xbf16, #tpu.memory_space<vmem>>, vector<1x8x8xbf16>
    %130 = vector.shape_cast %129 : vector<1x8x8xbf16> to vector<8x8xbf16>
    %cst_153 = arith.constant dense<0.000000e+00> : vector<64x8xf32>
    %131 = tpu.matmul %128, %130, %cst_153 {dimension_numbers = #tpu.dot_dimension_numbers<[1], [0], [0], [1], [0, 0, 1, 1], [], []>} : vector<64x8xbf16>, vector<8x8xbf16>, vector<64x8xf32> -> vector<64x8xf32>
    %132 = arith.addf %126, %131 : vector<64x8xf32>
    %c0_154 = arith.constant 0 : index
    %c0_155 = arith.constant 0 : index
    %133 = vector.load %arg5[%c0_154, %c0_155] : memref<1x8xf32, #tpu.memory_space<vmem>>, vector<1x8xf32>
    %134 = vector.broadcast %133 : vector<1x8xf32> to vector<64x8xf32>
    %135 = arith.addf %132, %134 : vector<64x8xf32>
    %136 = arith.addf %135, %79 : vector<64x8xf32>
    %cst_156 = arith.constant 0.000000e+00 : f32
    %137 = vector.broadcast %cst_156 : f32 to vector<64x8xf32>
    %138 = arith.maximumf %136, %137 : vector<64x8xf32>
    %139 = vector.shape_cast %138 : vector<64x8xf32> to vector<8x8x8xf32>
    %c0_157 = arith.constant 0 : index
    %c0_158 = arith.constant 0 : index
    %c0_159 = arith.constant 0 : index
    %c0_160 = arith.constant 0 : index
    %140 = vector.load %arg8[%c0_157, %c0_158, %c0_159, %c0_160] : memref<1x8x8x8xf32, #tpu.memory_space<vmem>>, vector<1x8x8x8xf32>
    %141 = vector.shape_cast %140 : vector<1x8x8x8xf32> to vector<8x8x8xf32>
    %142 = vector.shape_cast %139 : vector<8x8x8xf32> to vector<1x8x8x8xf32>
    tpu.vector_store %arg8[%c0_157, %c0_158, %c0_159, %c0_160], %142 {strides = array<i32>} : memref<1x8x8x8xf32, #tpu.memory_space<vmem>>, vector<1x8x8x8xf32>,
    return
  }
  func.func @transform_0(%arg0: i32) -> (i32, i32, i32, i32, i32) {
    %c0_i32 = arith.constant 0 : i32
    %c0_i32_0 = arith.constant 0 : i32
    %c0_i32_1 = arith.constant 0 : i32
    %c0_i32_2 = arith.constant 0 : i32
    %c0_i32_3 = arith.constant 0 : i32
    return %arg0, %c0_i32, %c0_i32_0, %c0_i32_1, %c0_i32_2 : i32, i32, i32, i32, i32
  }
  func.func @transform_1(%arg0: i32) -> (i32, i32, i32) {
    %c0_i32 = arith.constant 0 : i32
    %c0_i32_0 = arith.constant 0 : i32
    %c0_i32_1 = arith.constant 0 : i32
    %c0_i32_2 = arith.constant 0 : i32
    return %c0_i32, %c0_i32_0, %c0_i32_1 : i32, i32, i32
  }
  func.func @transform_2(%arg0: i32) -> (i32, i32) {
    %c0_i32 = arith.constant 0 : i32
    %c0_i32_0 = arith.constant 0 : i32
    %c0_i32_1 = arith.constant 0 : i32
    return %c0_i32, %c0_i32_0 : i32, i32
  }
  func.func @transform_3(%arg0: i32) -> (i32, i32, i32) {
    %c0_i32 = arith.constant 0 : i32
    %c0_i32_0 = arith.constant 0 : i32
    %c0_i32_1 = arith.constant 0 : i32
    %c0_i32_2 = arith.constant 0 : i32
    return %c0_i32, %c0_i32_0, %c0_i32_1 : i32, i32, i32
  }
  func.func @transform_4(%arg0: i32) -> (i32, i32) {
    %c0_i32 = arith.constant 0 : i32
    %c0_i32_0 = arith.constant 0 : i32
    %c0_i32_1 = arith.constant 0 : i32
    return %c0_i32, %c0_i32_0 : i32, i32
  }
  func.func @transform_5(%arg0: i32) -> (i32, i32) {
    %c0_i32 = arith.constant 0 : i32
    %c0_i32_0 = arith.constant 0 : i32
    %c0_i32_1 = arith.constant 0 : i32
    return %c0_i32, %c0_i32_0 : i32, i32
  }
  func.func @transform_6(%arg0: i32) -> (i32, i32) {
    %c0_i32 = arith.constant 0 : i32
    %c0_i32_0 = arith.constant 0 : i32
    %c0_i32_1 = arith.constant 0 : i32
    return %c0_i32, %c0_i32_0 : i32, i32
  }
  func.func @transform_7(%arg0: i32) -> (i32, i32, i32, i32) {
    %c0_i32 = arith.constant 0 : i32
    %c0_i32_0 = arith.constant 0 : i32
    %c0_i32_1 = arith.constant 0 : i32
    %c0_i32_2 = arith.constant 0 : i32
    return %arg0, %c0_i32, %c0_i32_0, %c0_i32_1 : i32, i32, i32, i32
  }
}

</mosaic_0001>

<bundles_post_ra>
// kernel: residual_block_pallas.1
= control target key start
LH: loop header
LB: loop body
LE: loop exit
PB: predicated region body
PF: predicated region fallthrough
CT: control target
= control target key end

     0   :  { %s3347_s24 = smov 0   ;;  %s4189_s0 = inlined_call_operand.vmem [shape: bf16[2,4,9,9,4], index: 0, kind: input, shape index: {}]   ;;  %s4190_s1 = inlined_call_operand.vmem [shape: bf16[9,4,8], index: 1, kind: input, shape index: {}]   ;;  %s4191_s2 = inlined_call_operand.vmem [shape: f32[1,8], index: 2, kind: input, shape index: {}]   ;;  %s4192_s3 = inlined_call_operand.vmem [shape: bf16[9,8,8], index: 3, kind: input, shape index: {}]   ;;  %s4193_s4 = inlined_call_operand.vmem [shape: f32[1,8], index: 4, kind: input, shape index: {}]   ;;  %s4194_s5 = inlined_call_operand.vmem [shape: bf16[4,8], index: 5, kind: input, shape index: {}]   ;;  %s4195_s6 = inlined_call_operand.vmem [shape: f32[1,8], index: 6, kind: input, shape index: {}]   ;;  %s4196_s7 = inlined_call_operand.vmem [shape: f32[2,8,8,8], index: 7, kind: output, shape index: {}]  }
   0x1 LB: > { %s2875_s25 = sadd.s32 4294967295, %s3304_s24   ;;  %p2879_p0 = scmp.ge.s32.totalorder %s3304_s24, 1  ;;  %s3304_s24 = sphi %s3347_s24, %s17_s24  }
   0x2   : > { %p237_p1 = scmp.lt.s32.totalorder %s3304_s24, 3 }
   0x4   : > { %p238_p2 = pnand %p2879_p0, %p237_p1 }
   0x5   : > { %p269_p3 = scmp.lt.s32.totalorder (!%p238_p2), %s2875_s25, 1 }
   0x6   : > { %241 = sbr.rel (%p238_p2) target bundleno = 631 (0x277), region = 48 }
   0xb   : > { %v2891_v0 = vld [vmem:[%s4190_s1 + $0x2] sm:$0x3]  ;;  %vm333_vm0 = vcmask 1041408   ;;  %v2945_v2 = vld [vmem:[%s4190_s1 + $0x6] sm:$0x3]  ;;  %s4206_s25 = smov (!%p269_p3, %s2875_s25), 1 }
   0xc   : > { %v335_v1 = vsel %vm333_vm0, %v2891_v0, 0  ;;  %v288_v3 = vld [vmem:[%s4190_s1] sm:$0x3]  ;;  %v671_v4 = vsel %vm333_vm0, %v2945_v2, 0  ;;  %v2932_v6 = vld [vmem:[%s4190_s1 + $0x4] sm:$0x3] }
   0xd   : > { %344 = vmatpush.bf16.msra.mxu0 %v335_v1  ;;  %3282 = vmatpush.bf16.msra.mxu3 %v335_v1  ;;  %v399_v5 = vsel %vm333_vm0, %v288_v3, 0  ;;  %v588_v7 = vsel %vm333_vm0, %v2932_v6, 0  ;;  %s3285_s11 = smul.u32 288, %s4206_s25  ;;  %vm320_vm1 = vcmask 31744   ;;  %vm446_vm2 = vsmask.f32 3328 }
   0xe   : > { %3283 = vmatpush.bf16.msra.mxu1 %v399_v5  ;;  %3284 = vmatpush.bf16.msra.mxu2 %v588_v7  ;;  %vm447_vm3 = vsmask.f32 7440  ;;  %vm1765_vm5 = vcmask 1043456   ;;  %vm1367_vm6 = vcmask 60416   ;;  %vm1369_vm7 = vcmask 57344   ;;  %s3241_s9 = sshll.u32 %s4206_s25, 6 }
   0xf   : > { %s3377_s14 = scalar_lea.vmem %s4189_s0, %s3285_s11  ;;  %vm3394_vm4 = vmor %vm446_vm2, %vm447_vm3  ;;  %vm1479_vm8 = vsmask.f32 7938  ;;  %vm1485_vm9 = vsmask.f32 256  ;;  %vm1886_vm12 = vcmask 1042432   ;;  %vm1887_vm13 = vcmask 1046532   ;;  %s4127_s12 = scalar_lea.vmem %s4196_s7, %s3241_s9 }
  0x10   : > { %v2894_v8 = vld [vmem:[%s3377_s14 + $0x48] sm:$0xf]  ;;  %v3246_v9 = vld [vmem:[%s3377_s14 + $0x4c] sm:$0xf0]  ;;  %v2898_v10 = vld [vmem:[%s3377_s14 + $0x58] sm:$0xf] }
  0x11   : > { %680 = vmatpush.bf16.msrb.mxu3 %v671_v4  ;;  %408 = vmatpush.bf16.msrb.mxu0 %v399_v5  ;;  %v2895_v11 = vor.u32 %v3246_v9, %v2894_v8  ;;  %v3247_v12 = vld [vmem:[%s3377_s14 + $0x5c] sm:$0xf0]  ;;  %v2918_v13 = vld [vmem:[%s3377_s14 + $0x10] sm:$0xf]  ;;  %v3243_v14 = vld [vmem:[%s3377_s14 + $0x14] sm:$0xf0] }
  0x12   : > { %v2899_v15 = vor.u32 %v3247_v12, %v2898_v10  ;;  %v2919_v16 = vor.u32 %v3243_v14, %v2918_v13  ;;  %v434_v17 = vld [vmem:[%s3377_s14 + $0x10] sm:$0xf]  ;;  %v435_v18 = vld [vmem:[%s3377_s14 + $0x14] sm:$0x1]  ;;  %v436_v19 = vld [vmem:[%s3377_s14 + $0x18] sm:$0xf] }
  0x13   : > { %2908 = vmatmul.msk.bf16.vlgmr.msra.gmra.mxu0 %vm320_vm1, %v2895_v11  ;;  %v437_v20 = vld [vmem:[%s3377_s14 + $0x1c] sm:$0x1]  ;;  %v478_v21 = vshrl.u32 %v434_v17, 16  ;;  %v481_v22 = vshll.u32 %v434_v17, 16  ;;  %v487_v23 = vshll.u32 %v435_v18, 16  ;;  %v492_v24 = vshrl.u32 %v436_v19, 16  ;;  %vm3734_vm10 = vmand %vm1367_vm6, %vm1479_vm8 }
  0x14   : > { %2909 = vmatmul.msk.bf16.vlgmr.msra.gmra.mxu3 %vm320_vm1, %v2899_v15  ;;  %2929 = vmatmul.msk.bf16.vlgmr.msra.gmra.mxu1 %vm320_vm1, %v2919_v16  ;;  %v495_v25 = vshll.u32 %v436_v19, 16  ;;  %v501_v26 = vshll.u32 %v437_v20, 16  ;;  %v2902_v33 = vld [vmem:[%s3377_s14 + $0x68] sm:$0xf]  ;;  %v438_v34 = vld [vmem:[%s3377_s14 + $0x20] sm:$0xf]  ;;  %vm3743_vm11 = vmand %vm1369_vm7, %vm1485_vm9 }
  0x15   : > { %v480_v27 = vrot.slane %v478_v21, 4  ;;  %v483_v28 = vrot.slane %v481_v22, 5  ;;  %v494_v29 = vrot.slane %v492_v24, 4  ;;  %597 = vmatpush.bf16.msra.mxu0 %v588_v7  ;;  %v489_v32 = vrot.slane %v487_v23, 5  ;;  %v440_v38 = vld [vmem:[%s3377_s14 + $0x28] sm:$0xf]  ;;  %vm3768_vm14 = vmor %vm1886_vm12, %vm1887_vm13 }
  0x16   : > { %v497_v30 = vrot.slane %v495_v25, 5  ;;  %v503_v37 = vrot.slane %v501_v26, 5  ;;  %v506_v39 = vshrl.u32 %v438_v34, 16  ;;  %v509_v40 = vshll.u32 %v438_v34, 16  ;;  %v3248_v42 = vld [vmem:[%s3377_s14 + $0x6c] sm:$0xf0] }
  0x17   : > { %v484_v31 = vor.u32 %v483_v28, %v480_v27  ;;  %v520_v43 = vshrl.u32 %v440_v38, 16  ;;  %v523_v44 = vshll.u32 %v440_v38, 16  ;;  %v2914_v46 = vld [vmem:[%s3377_s14] sm:$0xf]  ;;  %v439_v47 = vld [vmem:[%s3377_s14 + $0x24] sm:$0x1]  ;;  %v2903_v57 = vor.u32 %v3248_v42, %v2902_v33 }
  0x18   : > { %v498_v36 = vor.u32 %v497_v30, %v494_v29  ;;  %v508_v48 = vrot.slane %v506_v39, 4  ;;  %v511_v49 = vrot.slane %v509_v40, 5  ;;  %v441_v51 = vld [vmem:[%s3377_s14 + $0x2c] sm:$0x1]  ;;  %v430_v54 = vld [vmem:[%s3377_s14] sm:$0xf] }
  0x19   : > { %v485_v41 = vrot.slane %v484_v31, 4  ;;  %v522_v52 = vrot.slane %v520_v43, 4  ;;  %v525_v53 = vrot.slane %v523_v44, 5  ;;  %v3242_v58 = vld [vmem:[%s3377_s14 + $0x4] sm:$0xf0]  ;;  %v515_v0 = vshll.u32 %v439_v47, 16 }
  0x1a   : > { %v499_v45 = vrot.slane %v498_v36, 4  ;;  %v2922_v59 = vld [vmem:[%s3377_s14 + $0x20] sm:$0xf]  ;;  %v432_v60 = vld [vmem:[%s3377_s14 + $0x8] sm:$0xf]  ;;  %v512_v63 = vor.u32 %v511_v49, %v508_v48  ;;  %v450_v2 = vshrl.u32 %v430_v54, 16  ;;  %v2915_v9 = vor.u32 %v3242_v58, %v2914_v46 }
  0x1b   : > { %v490_v50 = vsel %vm3394_vm4, %v485_v41, %v489_v32  ;;  %v3244_v62 = vld [vmem:[%s3377_s14 + $0x24] sm:$0xf0]  ;;  %v431_v1 = vld [vmem:[%s3377_s14 + $0x4] sm:$0x1]  ;;  %v526_v3 = vor.u32 %v525_v53, %v522_v52  ;;  %v529_v4 = vshll.u32 %v441_v51, 16  ;;  %v453_v6 = vshll.u32 %v430_v54, 16 }
  0x1c   : > { %v504_v55 = vsel %vm3394_vm4, %v499_v45, %v503_v37  ;;  %v565_v56 = vunpack.c.l.b16 %v490_v50  ;;  %v433_v5 = vld [vmem:[%s3377_s14 + $0xc] sm:$0x1]  ;;  %v464_v7 = vshrl.u32 %v432_v60, 16  ;;  %v452_v10 = vrot.slane %v450_v2, 4  ;;  %v2974_v12 = vld [vmem:[%s4190_s1 + $0x8] sm:$0x3] }
  0x1d   : > { %v566_v61 = vunpack.c.l.b16 %v504_v55  ;;  %v467_v11 = vshll.u32 %v432_v60, 16  ;;  %v2923_v13 = vor.u32 %v3244_v62, %v2922_v59  ;;  %v455_v14 = vrot.slane %v453_v6, 5  ;;  %v442_v25 = vld [vmem:[%s3377_s14 + $0x30] sm:$0xf]  ;;  %v444_v27 = vld [vmem:[%s3377_s14 + $0x38] sm:$0xf] }
  0x1e   : > { %v459_v15 = vshll.u32 %v431_v1, 16  ;;  %v466_v16 = vrot.slane %v464_v7, 4  ;;  %v513_v17 = vrot.slane %v512_v63, 4  ;;  %v517_v18 = vrot.slane %v515_v0, 5  ;;  %v3053_v39 = vld [vmem:[%s4190_s1 + $0xe] sm:$0x3] }
  0x1f   : > { %v572_v8 = vpack.c.b16 %v566_v61, %v565_v56  ;;  %v469_v19 = vrot.slane %v467_v11, 5  ;;  %v473_v20 = vshll.u32 %v433_v5, 16  ;;  %v527_v21 = vrot.slane %v526_v3, 4  ;;  %v3011_v40 = vld [vmem:[%s4190_s1 + $0xa] sm:$0x3] }
  0x20   : > { %v531_v22 = vrot.slane %v529_v4, 5  ;;  %v456_v23 = vor.u32 %v455_v14, %v452_v10  ;;  %v754_v24 = vsel %vm333_vm0, %v2974_v12, 0  ;;  %v461_v29 = vrot.slane %v459_v15, 5  ;;  %v3024_v41 = vld [vmem:[%s4190_s1 + $0xc] sm:$0x3] }
  0x21   : > { %2934 = vmatmul.msk.bf16.vlgmr.msra.gmra.mxu2 %vm320_vm1, %v572_v8  ;;  %v470_v26 = vor.u32 %v469_v19, %v466_v16  ;;  %v475_v30 = vrot.slane %v473_v20, 5  ;;  %v518_v31 = vsel %vm3394_vm4, %v513_v17, %v517_v18  ;;  %v534_v33 = vshrl.u32 %v442_v25, 16  ;;  %v443_v45 = vld [vmem:[%s3377_s14 + $0x34] sm:$0x1]  ;;  %v2995_v46 = vld [vmem:[%s3377_s14 + $0x90] sm:$0xf] }
  0x22   : > { %v457_v28 = vrot.slane %v456_v23, 4  ;;  %v532_v34 = vsel %vm3394_vm4, %v527_v21, %v531_v22  ;;  %v537_v36 = vshll.u32 %v442_v25, 16  ;;  %v548_v37 = vshrl.u32 %v444_v27, 16  ;;  %v445_v48 = vld [vmem:[%s3377_s14 + $0x3c] sm:$0x1] }
  0x23   : > { %2928 = vmatmul.msk.bf16.vlgmr.msrb.gmra.mxu0 %vm320_vm1, %v2915_v9  ;;  %v471_v32 = vrot.slane %v470_v26, 4  ;;  %v551_v38 = vshll.u32 %v444_v27, 16  ;;  %v567_v42 = vunpack.c.l.b16 %v518_v31  ;;  %v568_v47 = vunpack.c.l.b16 %v532_v34  ;;  %v2997_v56 = vld [vmem:[%s3377_s14 + $0x98] sm:$0xf]  ;;  %v3249_v58 = vld [vmem:[%s3377_s14 + $0x7c] sm:$0xf0] }
  0x24   : > { %2910 = vmatmul.msk.bf16.gmra.mxu3 %vm320_vm1, %v2903_v57  ;;  %2930 = vmatmul.msk.bf16.gmra.mxu1 %vm320_vm1, %v2923_v13  ;;  %v462_v43 = vsel %vm3394_vm4, %v457_v28, %v461_v29  ;;  %v536_v49 = vrot.slane %v534_v33, 4  ;;  %v1114_v50 = vsel %vm333_vm0, %v3053_v39, 0  ;;  %v948_v51 = vsel %vm333_vm0, %v3011_v40, 0  ;;  %v2906_v57 = vld [vmem:[%s3377_s14 + $0x78] sm:$0xf] }
  0x25   : > { %763 = vmatpush.bf16.msrb.mxu0 %v754_v24  ;;  %v476_v44 = vsel %vm3394_vm4, %v471_v32, %v475_v30  ;;  %v539_v52 = vrot.slane %v537_v36, 5  ;;  %v550_v53 = vrot.slane %v548_v37, 4  ;;  %v553_v54 = vrot.slane %v551_v38, 5  ;;  %1123 = vmatpush.bf16.msra.mxu3 %v1114_v50  ;;  %v2926_v63 = vld [vmem:[%s3377_s14 + $0x30] sm:$0xf] }
  0x26   : > { %957 = vmatpush.bf16.msrb.mxu1 %v948_v51  ;;  %v1031_v55 = vsel %vm333_vm0, %v3024_v41, 0  ;;  %v563_v59 = vunpack.c.l.b16 %v462_v43  ;;  %v564_v60 = vunpack.c.l.b16 %v476_v44  ;;  %v810_v61 = vshrl.u32 %v2995_v46, 16  ;;  %v3245_v4 = vld [vmem:[%s3377_s14 + $0x34] sm:$0xf0]  ;;  %v2996_v10 = vld [vmem:[%s3377_s14 + $0x94] sm:$0x1] }
  0x27   : > { %1040 = vmatpush.bf16.msrb.mxu2 %v1031_v55  ;;  %v813_v62 = vshll.u32 %v2995_v46, 16  ;;  %v543_v0 = vshll.u32 %v443_v45, 16  ;;  %v824_v1 = vshrl.u32 %v2997_v56, 16  ;;  %v827_v2 = vshll.u32 %v2997_v56, 16  ;;  %v2998_v11 = vld [vmem:[%s3377_s14 + $0x9c] sm:$0x1] }
  0x28   : > { %v573_v3 = vpack.c.b16 %v568_v47, %v567_v42  ;;  %v557_v5 = vshll.u32 %v445_v48, 16  ;;  %v812_v6 = vrot.slane %v810_v61, 4  ;;  %v540_v8 = vor.u32 %v539_v52, %v536_v49  ;;  %v3090_v15 = vld [vmem:[%s4190_s1 + $0x10] sm:$0x3]  ;;  %v2999_v27 = vld [vmem:[%s3377_s14 + $0xa0] sm:$0xf] }
  0x29   : > { %v815_v7 = vrot.slane %v813_v62, 5  ;;  %v554_v9 = vor.u32 %v553_v54, %v550_v53  ;;  %v826_v12 = vrot.slane %v824_v1, 4  ;;  %v829_v13 = vrot.slane %v827_v2, 5  ;;  %v3001_v28 = vld [vmem:[%s3377_s14 + $0xa8] sm:$0xf] }
  0x2a   : > { %v571_v14 = vpack.c.b16 %v564_v60, %v563_v59  ;;  %v2907_v16 = vor.u32 %v3249_v58, %v2906_v57  ;;  %v2927_v17 = vor.u32 %v3245_v4, %v2926_v63  ;;  %v545_v18 = vrot.slane %v543_v0, 5  ;;  %v2977_v44 = vld [vmem:[%s3377_s14 + $0xd8] sm:$0xf]  ;;  %v3254_v45 = vld [vmem:[%s3377_s14 + $0xdc] sm:$0xf0] }
  0x2b   : > { %v816_v19 = vor.u32 %v815_v7, %v812_v6  ;;  %v819_v20 = vshll.u32 %v2996_v10, 16  ;;  %v830_v21 = vor.u32 %v829_v13, %v826_v12  ;;  %v833_v22 = vshll.u32 %v2998_v11, 16  ;;  %v3000_v52 = vld [vmem:[%s3377_s14 + $0xa4] sm:$0x1]  ;;  %v3002_v53 = vld [vmem:[%s3377_s14 + $0xac] sm:$0x1] }
  0x2c   : > { %v541_v23 = vrot.slane %v540_v8, 4  ;;  %v555_v24 = vrot.slane %v554_v9, 4  ;;  %v559_v25 = vrot.slane %v557_v5, 5  ;;  %v1308_v26 = vsel %vm333_vm0, %v3090_v15, 0  ;;  %v2948_v55 = vld [vmem:[%s3377_s14 + $0x90] sm:$0xf] }
  0x2d   : > { %v817_v29 = vrot.slane %v816_v19, 4  ;;  %v821_v30 = vrot.slane %v819_v20, 5  ;;  %v831_v31 = vrot.slane %v830_v21, 4  ;;  %v835_v32 = vrot.slane %v833_v22, 5  ;;  %v3250_v56 = vld [vmem:[%s3377_s14 + $0x94] sm:$0xf0] }
  0x2e   : > { %v546_v33 = vsel %vm3394_vm4, %v541_v23, %v545_v18  ;;  %v560_v34 = vsel %vm3394_vm4, %v555_v24, %v559_v25  ;;  %v838_v36 = vshrl.u32 %v2999_v27, 16  ;;  %v841_v37 = vshll.u32 %v2999_v27, 16  ;;  %v3003_v4 = vld [vmem:[%s3377_s14 + $0xb0] sm:$0xf]  ;;  %v3005_v5 = vld [vmem:[%s3377_s14 + $0xb8] sm:$0xf] }
  0x2f   : > { %v852_v38 = vshrl.u32 %v3001_v28, 16  ;;  %v855_v39 = vshll.u32 %v3001_v28, 16  ;;  %v569_v40 = vunpack.c.l.b16 %v546_v33  ;;  %v570_v41 = vunpack.c.l.b16 %v560_v34  ;;  %v3027_v12 = vld [vmem:[%s3377_s14 + $0x8] sm:$0xf]  ;;  %v3258_v13 = vld [vmem:[%s3377_s14 + $0xc] sm:$0xf0] }
  0x30   : > { %v822_v42 = vsel %vm3394_vm4, %v817_v29, %v821_v30  ;;  %v836_v43 = vsel %vm3394_vm4, %v831_v31, %v835_v32  ;;  %v840_v46 = vrot.slane %v838_v36, 4  ;;  %v843_v47 = vrot.slane %v841_v37, 5  ;;  %v3251_v15 = vld [vmem:[%s3377_s14 + $0xa4] sm:$0xf0]  ;;  %v3255_v19 = vld [vmem:[%s3377_s14 + $0xec] sm:$0xf0] }
  0x31   : > { %2935 = vmatmul.msk.bf16.gmra.mxu2 %vm320_vm1, %v573_v3  ;;  %v854_v48 = vrot.slane %v852_v38, 4  ;;  %v857_v49 = vrot.slane %v855_v39, 5  ;;  %v923_v50 = vunpack.c.l.b16 %v822_v42  ;;  %v924_v51 = vunpack.c.l.b16 %v836_v43  ;;  %v3004_v25 = vld [vmem:[%s3377_s14 + $0xb4] sm:$0x1]  ;;  %v3007_v39 = vld [vmem:[%s3377_s14 + $0xc0] sm:$0xf] }
  0x32   : > { %v574_v54 = vpack.c.b16 %v570_v41, %v569_v40  ;;  %v2978_v57 = vor.u32 %v3254_v45, %v2977_v44  ;;  %v844_v58 = vor.u32 %v843_v47, %v840_v46  ;;  %v847_v59 = vshll.u32 %v3000_v52, 16  ;;  %v3009_v40 = vld [vmem:[%s3377_s14 + $0xc8] sm:$0xf]  ;;  %v3031_v41 = vld [vmem:[%s3377_s14 + $0x18] sm:$0xf] }
  0x33   : > { %2933 = vmatmul.msk.bf16.vlgmr.msra.gmra.mxu0 %vm320_vm1, %v571_v14  ;;  %v858_v60 = vor.u32 %v857_v49, %v854_v48  ;;  %v861_v61 = vshll.u32 %v3002_v53, 16  ;;  %v2949_v62 = vor.u32 %v3250_v56, %v2948_v55  ;;  %v931_v63 = vpack.c.b16 %v924_v51, %v923_v50  ;;  %v2952_v14 = vld [vmem:[%s3377_s14 + $0xa0] sm:$0xf]  ;;  %v2956_v50 = vld [vmem:[%s3377_s14 + $0xb0] sm:$0xf] }
  0x34   : > { %2911 = vmatmul.msk.bf16.gmra.mxu3 %vm320_vm1, %v2907_v16  ;;  %2931 = vmatmul.msk.bf16.gmra.mxu1 %vm320_vm1, %v2927_v17  ;;  %v845_v0 = vrot.slane %v844_v58, 4  ;;  %v849_v1 = vrot.slane %v847_v59, 5  ;;  %v866_v8 = vshrl.u32 %v3003_v4, 16  ;;  %v869_v9 = vshll.u32 %v3003_v4, 16  ;;  %v2981_v16 = vld [vmem:[%s3377_s14 + $0xe8] sm:$0xf] }
  0x35   : > { %1317 = vmatpush.bf16.msra.mxu0 %v1308_v26  ;;  %v859_v2 = vrot.slane %v858_v60, 4  ;;  %v863_v3 = vrot.slane %v861_v61, 5  ;;  %v880_v10 = vshrl.u32 %v3005_v5, 16  ;;  %v883_v11 = vshll.u32 %v3005_v5, 16  ;;  %v3006_v26 = vld [vmem:[%s3377_s14 + $0xbc] sm:$0x1] }
  0x36   : > { %v850_v6 = vsel %vm3394_vm4, %v845_v0, %v849_v1  ;;  %v868_v20 = vrot.slane %v866_v8, 4  ;;  %v871_v21 = vrot.slane %v869_v9, 5  ;;  %v3028_v24 = vor.u32 %v3258_v13, %v3027_v12  ;;  %v3259_v44 = vld [vmem:[%s3377_s14 + $0x1c] sm:$0xf0]  ;;  %v2985_v51 = vld [vmem:[%s3377_s14 + $0xf8] sm:$0xf] }
  0x37   : > { %v864_v7 = vsel %vm3394_vm4, %v859_v2, %v863_v3  ;;  %v925_v17 = vunpack.c.l.b16 %v850_v6  ;;  %v882_v22 = vrot.slane %v880_v10, 4  ;;  %v885_v23 = vrot.slane %v883_v11, 5  ;;  %v3256_v52 = vld [vmem:[%s3377_s14 + $0xfc] sm:$0xf0]  ;;  %v3252_v55 = vld [vmem:[%s3377_s14 + $0xb4] sm:$0xf0] }
  0x38   : > { %v926_v18 = vunpack.c.l.b16 %v864_v7  ;;  %v2953_v27 = vor.u32 %v3251_v15, %v2952_v14  ;;  %v2982_v28 = vor.u32 %v3255_v19, %v2981_v16  ;;  %v872_v30 = vor.u32 %v871_v21, %v868_v20  ;;  %v3008_v60 = vld [vmem:[%s3377_s14 + $0xc4] sm:$0x1]  ;;  %v3010_v61 = vld [vmem:[%s3377_s14 + $0xcc] sm:$0x1]  ;;  %v3074_v5 = vld [vmem:[%s3377_s14 + $0x8] sm:$0xf] }
  0x39   : > { %v875_v31 = vshll.u32 %v3004_v25, 16  ;;  %v886_v32 = vor.u32 %v885_v23, %v882_v22  ;;  %v889_v33 = vshll.u32 %v3006_v26, 16  ;;  %v894_v45 = vshrl.u32 %v3007_v39, 16  ;;  %v3076_v10 = vld [vmem:[%s3377_s14 + $0x10] sm:$0xf] }
  0x3a   : > { %v932_v29 = vpack.c.b16 %v926_v18, %v925_v17  ;;  %v873_v34 = vrot.slane %v872_v30, 4  ;;  %v897_v46 = vshll.u32 %v3007_v39, 16  ;;  %v908_v47 = vshrl.u32 %v3009_v40, 16  ;;  %v3035_v17 = vld [vmem:[%s3377_s14 + $0x28] sm:$0xf] }
  0x3b   : > { %v877_v36 = vrot.slane %v875_v31, 5  ;;  %v887_v37 = vrot.slane %v886_v32, 4  ;;  %v891_v38 = vrot.slane %v889_v33, 5  ;;  %v911_v48 = vshll.u32 %v3009_v40, 16  ;;  %v3260_v18 = vld [vmem:[%s3377_s14 + $0x2c] sm:$0xf0] }
  0x3c   : > { %v3032_v49 = vor.u32 %v3259_v44, %v3031_v41  ;;  %v896_v56 = vrot.slane %v894_v45, 4  ;;  %v910_v58 = vrot.slane %v908_v47, 4  ;;  %v903_v2 = vshll.u32 %v3008_v60, 16  ;;  %v2960_v19 = vld [vmem:[%s3377_s14 + $0xc0] sm:$0xf] }
  0x3d   : > { %v878_v42 = vsel %vm3394_vm4, %v873_v34, %v877_v36  ;;  %v892_v43 = vsel %vm3394_vm4, %v887_v37, %v891_v38  ;;  %v913_v59 = vrot.slane %v911_v48, 5  ;;  %v917_v4 = vshll.u32 %v3010_v61, 16  ;;  %v3253_v20 = vld [vmem:[%s3377_s14 + $0xc4] sm:$0xf0]  ;;  %v3075_v30 = vld [vmem:[%s3377_s14 + $0xc] sm:$0x1] }
  0x3e   : > { %v927_v53 = vunpack.c.l.b16 %v878_v42  ;;  %v905_v7 = vrot.slane %v903_v2, 5  ;;  %v1170_v11 = vshrl.u32 %v3074_v5, 16  ;;  %v1173_v12 = vshll.u32 %v3074_v5, 16  ;;  %v2989_v23 = vld [vmem:[%s3377_s14 + $0x108] sm:$0xf] }
  0x3f   : > { %v914_v3 = vor.u32 %v913_v59, %v910_v58  ;;  %v919_v9 = vrot.slane %v917_v4, 5  ;;  %v1184_v13 = vshrl.u32 %v3076_v10, 16  ;;  %v1187_v14 = vshll.u32 %v3076_v10, 16  ;;  %v3077_v31 = vld [vmem:[%s3377_s14 + $0x14] sm:$0x1] }
  0x40   : > { %v1172_v21 = vrot.slane %v1170_v11, 4  ;;  %v1175_v22 = vrot.slane %v1173_v12, 5  ;;  %v2961_v32 = vor.u32 %v3253_v20, %v2960_v19  ;;  %v1179_v37 = vshll.u32 %v3075_v30, 16  ;;  %v3078_v40 = vld [vmem:[%s3377_s14 + $0x18] sm:$0xf] }
  0x41   : > { %2936 = vmatmul.msk.bf16.gmra.mxu2 %vm320_vm1, %v574_v54  ;;  %v928_v54 = vunpack.c.l.b16 %v892_v43  ;;  %v915_v8 = vrot.slane %v914_v3, 4  ;;  %v1193_v39 = vshll.u32 %v3077_v31, 16  ;;  %v3080_v41 = vld [vmem:[%s3377_s14 + $0x20] sm:$0xf]  ;;  %v1201_v47 = vshll.u32 %v3078_v40, 16 }
  0x42   : > { %v1176_v34 = vor.u32 %v1175_v22, %v1172_v21  ;;  %v1181_v43 = vrot.slane %v1179_v37, 5  ;;  %v1212_v48 = vshrl.u32 %v3080_v41, 16  ;;  %v3079_v60 = vld [vmem:[%s3377_s14 + $0x1c] sm:$0x1]  ;;  %v3081_v61 = vld [vmem:[%s3377_s14 + $0x24] sm:$0x1] }
  0x43   : > { %2991 = vmatmul.msk.bf16.vlgmr.msrb.gmra.mxu0 %vm320_vm1, %v2978_v57  ;;  %v899_v57 = vrot.slane %v897_v46, 5  ;;  %v933_v0 = vpack.c.b16 %v928_v54, %v927_v53  ;;  %v920_v16 = vsel %vm3394_vm4, %v915_v8, %v919_v9  ;;  %v1195_v45 = vrot.slane %v1193_v39, 5  ;;  %v3261_v53 = vld [vmem:[%s3377_s14 + $0x3c] sm:$0xf0]  ;;  %v3082_v11 = vld [vmem:[%s3377_s14 + $0x28] sm:$0xf] }
  0x44   : > { %2962 = vmatmul.msk.bf16.vlgmr.msrb.gmra.mxu3 %vm320_vm1, %v2949_v62  ;;  %3012 = vmatmul.msk.bf16.vlgmr.msrb.gmra.mxu1 %vm320_vm1, %v931_v63  ;;  %v2986_v62 = vor.u32 %v3256_v52, %v2985_v51  ;;  %v2957_v63 = vor.u32 %v3252_v55, %v2956_v50  ;;  %v930_v26 = vunpack.c.l.b16 %v920_v16  ;;  %v1177_v42 = vrot.slane %v1176_v34, 4  ;;  %v3039_v52 = vld [vmem:[%s3377_s14 + $0x38] sm:$0xf]  ;;  %v3084_v12 = vld [vmem:[%s3377_s14 + $0x30] sm:$0xf] }
  0x45   : > { %v900_v1 = vor.u32 %v899_v57, %v896_v56  ;;  %v1198_v46 = vshrl.u32 %v3078_v40, 16  ;;  %v1203_v55 = vrot.slane %v1201_v47, 5  ;;  %v1214_v56 = vrot.slane %v1212_v48, 4 }
  0x46   : > { %v1182_v50 = vsel %vm3394_vm4, %v1177_v42, %v1181_v43  ;;  %v1207_v2 = vshll.u32 %v3079_v60, 16  ;;  %v1221_v4 = vshll.u32 %v3081_v61, 16  ;;  %v1229_v16 = vshll.u32 %v3082_v11, 16  ;;  %v3088_v42 = vld [vmem:[%s3377_s14 + $0x40] sm:$0xf] }
  0x47   : > { %v901_v6 = vrot.slane %v900_v1, 4  ;;  %v1200_v54 = vrot.slane %v1198_v46, 4  ;;  %v1283_v58 = vunpack.c.l.b16 %v1182_v50  ;;  %v1271_v50 = vshll.u32 %v3088_v42, 16  ;;  %v3089_v60 = vld [vmem:[%s3377_s14 + $0x44] sm:$0x1] }
  0x48   : > { %v1209_v8 = vrot.slane %v1207_v2, 5  ;;  %v1223_v10 = vrot.slane %v1221_v4, 5  ;;  %v1231_v22 = vrot.slane %v1229_v16, 5  ;;  %v1277_v4 = vshll.u32 %v3089_v60, 16  ;;  %v3068_v16 = vld [vmem:[%s3377_s14 + $0x80] sm:$0xf] }
  0x49   : > { %v906_v15 = vsel %vm3394_vm4, %v901_v6, %v905_v7  ;;  %v1204_v1 = vor.u32 %v1203_v55, %v1200_v54  ;;  %v3264_v54 = vld [vmem:[%s3377_s14 + $0x74] sm:$0xf0]  ;;  %vm1752_vm15 = vcmask 64512  }
  0x4a   : > { %v929_v25 = vunpack.c.l.b16 %v906_v15  ;;  %v1226_v15 = vshrl.u32 %v3082_v11, 16 }
  0x4b   : > { %v1205_v7 = vrot.slane %v1204_v1, 4 }
  0x4c   : > { %v934_v36 = vpack.c.b16 %v930_v26, %v929_v25  ;;  %v1228_v21 = vrot.slane %v1226_v15, 4  ;;  %v3083_v25 = vld [vmem:[%s3377_s14 + $0x2c] sm:$0x1]  ;;  %v3085_v26 = vld [vmem:[%s3377_s14 + $0x34] sm:$0x1] }
  0x4d   : > { %v1235_v31 = vshll.u32 %v3083_v25, 16 }
  0x4e   : > { %v1232_v30 = vor.u32 %v1231_v22, %v1228_v21 }
  0x50   : > { %v1233_v37 = vrot.slane %v1232_v30, 4 }
  0x51   : > { %3041 = vmatmul.msk.bf16.vlgmr.msrb.gmra.mxu2 %vm320_vm1, %v3028_v24  ;;  %v3257_v24 = vld [vmem:[%s3377_s14 + $0x10c] sm:$0xf0] }
  0x52   : > { %v2990_v33 = vor.u32 %v3257_v24, %v2989_v23 }
  0x53   : > { %2992 = vmatmul.msk.bf16.gmra.mxu0 %vm320_vm1, %v2982_v28  ;;  %v1189_v28 = vrot.slane %v1187_v14, 5 }
  0x54   : > { %2963 = vmatmul.msk.bf16.gmra.mxu3 %vm320_vm1, %v2953_v27  ;;  %3013 = vmatmul.msk.bf16.gmra.mxu1 %vm320_vm1, %v932_v29  ;;  %v1186_v27 = vrot.slane %v1184_v13, 4  ;;  %v3036_v29 = vor.u32 %v3260_v18, %v3035_v17  ;;  %v1210_v13 = vsel %vm3394_vm4, %v1205_v7, %v1209_v8  ;;  %v1240_v17 = vshrl.u32 %v3084_v12, 16 }
  0x55   : > { %v1243_v18 = vshll.u32 %v3084_v12, 16  ;;  %v1285_v19 = vunpack.c.l.b16 %v1210_v13 }
  0x56   : > { %v1190_v38 = vor.u32 %v1189_v28, %v1186_v27  ;;  %v1242_v23 = vrot.slane %v1240_v17, 4  ;;  %v3060_v27 = vld [vmem:[%s3377_s14 + $0x60] sm:$0xf]  ;;  %v3263_v28 = vld [vmem:[%s3377_s14 + $0x64] sm:$0xf0] }
  0x57   : > { %v1245_v24 = vrot.slane %v1243_v18, 5  ;;  %v3265_v17 = vld [vmem:[%s3377_s14 + $0x84] sm:$0xf0] }
  0x58   : > { %v1191_v44 = vrot.slane %v1190_v38, 4  ;;  %v1237_v38 = vrot.slane %v1235_v31, 5  ;;  %v3069_v21 = vor.u32 %v3265_v17, %v3068_v16 }
  0x5a   : > { %v1196_v51 = vsel %vm3394_vm4, %v1191_v44, %v1195_v45  ;;  %v1238_v44 = vsel %vm3394_vm4, %v1233_v37, %v1237_v38  ;;  %v3105_v37 = vld [vmem:[%s3377_s14 + $0xd8] sm:$0xf]  ;;  %v3266_v38 = vld [vmem:[%s3377_s14 + $0xdc] sm:$0xf0] }
  0x5b   : > { %v1284_v59 = vunpack.c.l.b16 %v1196_v51  ;;  %v3064_v51 = vld [vmem:[%s3377_s14 + $0x70] sm:$0xf] }
  0x5d   : > { %v1291_v5 = vpack.c.b16 %v1284_v59, %v1283_v58  ;;  %v1273_v58 = vrot.slane %v1271_v50, 5  ;;  %v3087_v59 = vld [vmem:[%s3377_s14 + $0x3c] sm:$0x1] }
  0x5e   : > { %v1263_v2 = vshll.u32 %v3087_v59, 16 }
  0x60   : > { %v1265_v7 = vrot.slane %v1263_v2, 5 }
  0x61   : > { %3042 = vmatmul.msk.bf16.gmra.mxu2 %vm320_vm1, %v3032_v49  ;;  %v1215_v49 = vshll.u32 %v3080_v41, 16  ;;  %v3086_v41 = vld [vmem:[%s3377_s14 + $0x38] sm:$0xf] }
  0x62   : > { %v1254_v47 = vshrl.u32 %v3086_v41, 16  ;;  %v1257_v48 = vshll.u32 %v3086_v41, 16  ;;  %v3123_v41 = vld [vmem:[%s4192_s3 + $0x4] sm:$0xf] }
  0x63   : > { %2993 = vmatmul.msk.bf16.gmra.mxu0 %vm320_vm1, %v2986_v62  ;;  %v1217_v57 = vrot.slane %v1215_v49, 5  ;;  %v3040_v62 = vor.u32 %v3261_v53, %v3039_v52  ;;  %v1268_v49 = vshrl.u32 %v3088_v42, 16  ;;  %v1287_v52 = vunpack.c.l.b16 %v1238_v44 }
  0x64   : > { %2964 = vmatmul.msk.bf16.gmra.mxu3 %vm320_vm1, %v2957_v63  ;;  %3014 = vmatmul.msk.bf16.gmra.mxu1 %vm320_vm1, %v933_v0  ;;  %v3056_v63 = vld [vmem:[%s3377_s14 + $0x50] sm:$0xf]  ;;  %v3262_v0 = vld [vmem:[%s3377_s14 + $0x54] sm:$0xf0]  ;;  %v1256_v55 = vrot.slane %v1254_v47, 4  ;;  %v1767_v42 = vsel %vm1765_vm5, %v3123_v41, 0 }
  0x65   : > { %v1218_v3 = vor.u32 %v1217_v57, %v1214_v56  ;;  %v3057_v6 = vor.u32 %v3262_v0, %v3056_v63  ;;  %v1259_v56 = vrot.slane %v1257_v48, 5  ;;  %v1270_v57 = vrot.slane %v1268_v49, 4  ;;  %1776 = vmatpush.bf16.msra.mxu2 %v1767_v42 }
  0x67   : > { %v1219_v9 = vrot.slane %v1218_v3, 4  ;;  %v1260_v1 = vor.u32 %v1259_v56, %v1256_v55  ;;  %v1274_v3 = vor.u32 %v1273_v58, %v1270_v57 }
  0x69   : > { %v1224_v14 = vsel %vm3394_vm4, %v1219_v9, %v1223_v10  ;;  %v1275_v8 = vrot.slane %v1274_v3, 4  ;;  %v1279_v9 = vrot.slane %v1277_v4, 5  ;;  %v3306_v4 = vmov 0  }
  0x6a   : > { %v1286_v20 = vunpack.c.l.b16 %v1224_v14  ;;  %1371 = vst.msk [vmem:[#allocation2 + $0x8] sm:$0xf] %vm1367_vm6, %v3306_v4 }
  0x6b   : > { %v1280_v13 = vsel %vm3394_vm4, %v1275_v8, %v1279_v9  ;;  %1372 = vst.msk [vmem:[#allocation2 + $0xc] sm:$0x1] %vm1369_vm7, %v3306_v4 }
  0x6c   : > { %v1290_v15 = vunpack.c.l.b16 %v1280_v13  ;;  %1368 = vst.msk [vmem:[#allocation2] sm:$0xf] %vm1367_vm6, %v3306_v4  ;;  %v3269_v13 = vld [vmem:[%s3377_s14 + $0x10c] sm:$0xf0] }
  0x6d   : > { %1370 = vst.msk [vmem:[#allocation2 + $0x4] sm:$0x1] %vm1369_vm7, %v3306_v4 }
  0x6e   : > { %1373 = vst.msk [vmem:[#allocation2 + $0x10] sm:$0xf] %vm1367_vm6, %v3306_v4 }
  0x6f   : > { %1374 = vst.msk [vmem:[#allocation2 + $0x14] sm:$0x1] %vm1369_vm7, %v3306_v4 }
  0x70   : > { %1375 = vst.msk [vmem:[#allocation2 + $0x18] sm:$0xf] %vm1367_vm6, %v3306_v4 }
  0x71   : > { %3043 = vmatmul.msk.bf16.gmra.mxu2 %vm320_vm1, %v3036_v29  ;;  %v1292_v29 = vpack.c.b16 %v1286_v20, %v1285_v19  ;;  %1376 = vst.msk [vmem:[#allocation2 + $0x1c] sm:$0x1] %vm1369_vm7, %v3306_v4 }
  0x72   : > { %1377 = vst.msk [vmem:[#allocation2 + $0x20] sm:$0xf] %vm1367_vm6, %v3306_v4 }
  0x73   : > { %2994 = vmatmul.msk.bf16.gmra.mxu0 %vm320_vm1, %v2990_v33  ;;  %v1249_v33 = vshll.u32 %v3085_v26, 16  ;;  %1378 = vst.msk [vmem:[#allocation2 + $0x24] sm:$0x1] %vm1369_vm7, %v3306_v4 }
  0x74   : > { %2965 = vmatmul.msk.bf16.gmra.mxu3 %vm320_vm1, %v2961_v32  ;;  %3015 = vmatmul.msk.bf16.gmra.mxu1 %vm320_vm1, %v934_v36  ;;  %v1246_v32 = vor.u32 %v1245_v24, %v1242_v23  ;;  %v3061_v36 = vor.u32 %v3263_v28, %v3060_v27  ;;  %1379 = vst.msk [vmem:[#allocation2 + $0x28] sm:$0xf] %vm1367_vm6, %v3306_v4 }
  0x75   : > { %v1251_v40 = vrot.slane %v1249_v33, 5  ;;  %1380 = vst.msk [vmem:[#allocation2 + $0x2c] sm:$0x1] %vm1369_vm7, %v3306_v4 }
  0x76   : > { %v1247_v39 = vrot.slane %v1246_v32, 4  ;;  %1381 = vst.msk [vmem:[#allocation2 + $0x30] sm:$0xf] %vm1367_vm6, %v3306_v4 }
  0x77   : > { %1382 = vst.msk [vmem:[#allocation2 + $0x34] sm:$0x1] %vm1369_vm7, %v3306_v4 }
  0x78   : > { %v1252_v45 = vsel %vm3394_vm4, %v1247_v39, %v1251_v40  ;;  %v3106_v40 = vor.u32 %v3266_v38, %v3105_v37  ;;  %1383 = vst.msk [vmem:[#allocation2 + $0x38] sm:$0xf] %vm1367_vm6, %v3306_v4 }
  0x79   : > { %v1288_v53 = vunpack.c.l.b16 %v1252_v45  ;;  %1384 = vst.msk [vmem:[#allocation2 + $0x3c] sm:$0x1] %vm1369_vm7, %v3306_v4 }
  0x7a   : > { %1385 = vst.msk [vmem:[#allocation2 + $0x40] sm:$0xf] %vm1367_vm6, %v3306_v4 }
  0x7b   : > { %v1293_v63 = vpack.c.b16 %v1288_v53, %v1287_v52  ;;  %v3109_v52 = vld [vmem:[%s3377_s14 + $0xe8] sm:$0xf]  ;;  %v3267_v53 = vld [vmem:[%s3377_s14 + $0xec] sm:$0xf0]  ;;  %1386 = vst.msk [vmem:[#allocation2 + $0x44] sm:$0x1] %vm1369_vm7, %v3306_v4 }
  0x7c   : > { %1387 = vst.msk [vmem:[#allocation2 + $0x48] sm:$0xf] %vm1367_vm6, %v3306_v4 }
  0x7d   : > { %1388 = vst.msk [vmem:[#allocation2 + $0x4c] sm:$0x1] %vm1369_vm7, %v3306_v4 }
  0x81   : > { %3044 = vmatmul.msk.bf16.gmra.mxu2 %vm320_vm1, %v3040_v62  ;;  %v3065_v62 = vor.u32 %v3264_v54, %v3064_v51  ;;  %v3110_v54 = vor.u32 %v3267_v53, %v3109_v52 }
  0x83   : > { %3091 = vmatmul.msk.bf16.vlgmr.msra.gmra.mxu0 %vm320_vm1, %v1291_v5 }
  0x84   : > { %3070 = vmatmul.msk.bf16.vlgmr.msra.gmra.mxu3 %vm320_vm1, %v3057_v6  ;;  %v1261_v6 = vrot.slane %v1260_v1, 4 }
  0x86   : > { %v1266_v12 = vsel %vm3394_vm4, %v1261_v6, %v1265_v7 }
  0x87   : > { %v1289_v14 = vunpack.c.l.b16 %v1266_v12  ;;  %v3117_v12 = vld [vmem:[%s3377_s14 + $0x108] sm:$0xf] }
  0x89   : > { %v1294_v19 = vpack.c.b16 %v1290_v15, %v1289_v14  ;;  %v3118_v14 = vor.u32 %v3269_v13, %v3117_v12 }
  0x90   : > { %v346_v34 = vpop.f32.mrf.mxu0 }
  0x91   : > { %v3593_v22 = vpop.f32.mrf.mxu1 }
  0x93   : > { %3092 = vmatmul.msk.bf16.gmra.mxu0 %vm320_vm1, %v1292_v29 }
  0x94   : > { %3071 = vmatmul.msk.bf16.gmra.mxu3 %vm320_vm1, %v3061_v36 }
  0x97   : > { %v3565_v43 = vpop.f32.mrf.mxu3 }
  0x98   : > { %v3571_v46 = vpop.f32.mrf.mxu0  ;;  %v416_v42 = vadd.f32 %v3593_v22, %v3565_v43 }
  0x99   : > { %v3605_v27 = vpop.f32.mrf.mxu1 }
  0x9f   : > { %v3577_v61 = vpop.f32.mrf.mxu3 }
  0xa0   : > { %v410_v0 = vpop.f32.mrf.mxu0  ;;  %v418_v4 = vadd.f32 %v3605_v27, %v3577_v61 }
  0xa1   : > { %v411_v5 = vadd.f32 %v410_v0, %v346_v34  ;;  %v3613_v31 = vpop.f32.mrf.mxu1  ;;  %v1540_v34 = vld [vmem:[%s4194_s5] sm:$0x3] }
  0xa2   : > { %v1578_v36 = vsel %vm333_vm0, %v1540_v34, 0  ;;  %v3268_v0 = vld [vmem:[%s3377_s14 + $0xfc] sm:$0xf0] }
  0xa3   : > { %3093 = vmatmul.msk.bf16.gmra.mxu0 %vm320_vm1, %v1293_v63  ;;  %1587 = vmatpush.bf16.msra.mxu1 %v1578_v36  ;;  %v3113_v63 = vld [vmem:[%s3377_s14 + $0xf8] sm:$0xf] }
  0xa4   : > { %3072 = vmatmul.msk.bf16.gmra.mxu3 %vm320_vm1, %v3065_v62  ;;  %v3599_v24 = vpop.f32.mrf.mxu2  ;;  %v3114_v2 = vor.u32 %v3268_v0, %v3113_v63 }
  0xa6   : > { %3119 = vmatmul.msk.bf16.vlgmr.msra.gmra.mxu1 %vm320_vm1, %v3106_v40 }
  0xa7   : > { %v3581_v10 = vpop.f32.mrf.mxu3 }
  0xa8   : > { %v3583_v11 = vpop.f32.mrf.mxu0 }
  0xa9   : > { %v3630_v44 = vpop.f32.mrf.mxu1 }
  0xac   : > { %v3611_v30 = vpop.f32.mrf.mxu2 }
  0xad   : > { %v622_v13 = vadd.f32 %v3611_v30, %v418_v4 }
  0xaf   : > { %v3591_v18 = vpop.f32.mrf.mxu3 }
  0xb0   : > { %v599_v20 = vpop.f32.mrf.mxu0 }
  0xb1   : > { %v3595_v23 = vadd.f32 %v599_v20, %v411_v5  ;;  %v3642_v51 = vpop.f32.mrf.mxu1  ;;  %v413_v20 = vadd.f32 %v3583_v11, %v3571_v46  ;;  %v3156_v11 = vld [vmem:[%s4192_s3 + $0x8] sm:$0xf] }
  0xb2   : > { %v1948_v38 = vsel %vm1765_vm5, %v3156_v11, 0 }
  0xb3   : > { %3094 = vmatmul.msk.bf16.gmra.mxu0 %vm320_vm1, %v1294_v19 }
  0xb4   : > { %3073 = vmatmul.msk.bf16.gmra.mxu3 %vm320_vm1, %v3069_v21  ;;  %v3623_v39 = vpop.f32.mrf.mxu2  ;;  %1957 = vmatpush.bf16.msrb.mxu0 %v1948_v38 }
  0xb6   : > { %3120 = vmatmul.msk.bf16.gmra.mxu1 %vm320_vm1, %v3110_v54  ;;  %v3161_v54 = vld [vmem:[%s4192_s3 + $0xc] sm:$0xf] }
  0xb7   : > { %v3601_v25 = vpop.f32.mrf.mxu3  ;;  %v2030_v0 = vsel %vm1765_vm5, %v3161_v54, 0 }
  0xb8   : > { %v3603_v26 = vpop.f32.mrf.mxu0  ;;  %2039 = vmatpush.bf16.msrb.mxu1 %v2030_v0 }
  0xb9   : > { %v3653_v58 = vpop.f32.mrf.mxu1  ;;  %v620_v36 = vadd.f32 %v3603_v26, %v413_v20 }
  0xbc   : > { %v3636_v48 = vpop.f32.mrf.mxu2 }
  0xbf   : > { %v3607_v28 = vpop.f32.mrf.mxu3 }
  0xc0   : > { %v3609_v29 = vpop.f32.mrf.mxu0 }
  0xc1   : > { %v959_v1 = vpop.f32.mrf.mxu1 }
  0xc4   : > { %v3647_v55 = vpop.f32.mrf.mxu2 }
  0xc6   : > { %3121 = vmatmul.msk.bf16.gmra.mxu1 %vm320_vm1, %v3114_v2 }
  0xc7   : > { %v682_v32 = vpop.f32.mrf.mxu3 }
  0xc8   : > { %v3615_v33 = vpop.f32.mrf.mxu0  ;;  %v702_v15 = vadd.f32 %v682_v32, %v3595_v23  ;;  %v1617_v32 = vld [vmem:[%s4192_s3] sm:$0xf] }
  0xc9   : > { %v961_v7 = vpop.f32.mrf.mxu1  ;;  %v1831_v34 = vsel %vm1765_vm5, %v1617_v32, 0 }
  0xca   : > { %v785_v21 = vadd.f32 %v3609_v29, %v702_v15  ;;  %1840 = vmatpush.bf16.msrb.mxu3 %v1831_v34 }
  0xcc   : > { %v3659_v62 = vpop.f32.mrf.mxu2  ;;  %v979_v37 = vadd.f32 %v959_v1, %v785_v21  ;;  %v621_v1 = vadd.f32 %v3599_v24, %v416_v42 }
  0xcf   : > { %v3632_v45 = vpop.f32.mrf.mxu3 }
  0xd0   : > { %v3634_v47 = vpop.f32.mrf.mxu0  ;;  %v703_v46 = vadd.f32 %v3632_v45, %v620_v36  ;;  %v3717_v45 = vld [vmem:[%s4191_s2] ss:$0 sm:$0xff] }
  0xd1   : > { %v964_v17 = vpop.f32.mrf.mxu1  ;;  %v1609_v36 = vld [vmem:[#allocation2] sm:$0xf] }
  0xd2   : > { %v786_v26 = vadd.f32 %v3615_v33, %v703_v46  ;;  %v1481_v46 = vld [vmem:[#allocation2 + $0x8] sm:$0xf] }
  0xd4   : > { %v1042_v6 = vpop.f32.mrf.mxu2  ;;  %v980_v43 = vadd.f32 %v961_v7, %v786_v26  ;;  %v423_v26 = vadd.f32 %v3630_v44, %v3591_v18 }
  0xd5   : > { %v1062_v29 = vadd.f32 %v1042_v6, %v979_v37 }
  0xd6   : > { %3122 = vmatmul.msk.bf16.gmra.mxu1 %vm320_vm1, %v3118_v14 }
  0xd7   : > { %v3638_v49 = vpop.f32.mrf.mxu3 }
  0xd8   : > { %v3640_v50 = vpop.f32.mrf.mxu0  ;;  %v704_v22 = vadd.f32 %v3638_v49, %v621_v1 }
  0xd9   : > { %v966_v63 = vpop.f32.mrf.mxu1 }
  0xda   : > { %v787_v15 = vadd.f32 %v3634_v47, %v704_v22 }
  0xdc   : > { %v1044_v16 = vpop.f32.mrf.mxu2  ;;  %v981_v61 = vadd.f32 %v964_v17, %v787_v15  ;;  %v1487_v17 = vld [vmem:[#allocation2 + $0xc] sm:$0x1] }
  0xdd   : > { %v1063_v6 = vadd.f32 %v1044_v16, %v980_v43  ;;  %v426_v43 = vadd.f32 %v3642_v51, %v3601_v25 }
  0xdf   : > { %v3649_v56 = vpop.f32.mrf.mxu3 }
  0xe0   : > { %v3651_v57 = vpop.f32.mrf.mxu0 }
  0xe1   : > { %v3731_v34 = vpop.f32.mrf.mxu1 }
  0xe4   : > { %v1047_v40 = vpop.f32.mrf.mxu2 }
  0xe7   : > { %v3655_v59 = vpop.f32.mrf.mxu3 }
  0xe8   : > { %v3657_v60 = vpop.f32.mrf.mxu0 }
  0xec   : > { %v1049_v7 = vpop.f32.mrf.mxu2 }
  0xef   : > { %v3664_v3 = vpop.f32.mrf.mxu3 }
  0xf0   : > { %v3667_v5 = vpop.f32.mrf.mxu0 }
  0xf7   : > { %v3676_v8 = vpop.f32.mrf.mxu3 }
  0xf8   : > { %v3679_v9 = vpop.f32.mrf.mxu0 }
  0xff   : > { %v3692_v19 = vpop.f32.mrf.mxu3 }
 0x100   : > { %v1319_v23 = vpop.f32.mrf.mxu0 }
 0x107   : > { %v1125_v41 = vpop.f32.mrf.mxu3 }
 0x108   : > { %v1145_v52 = vadd.f32 %v1125_v41, %v1062_v29  ;;  %v1321_v53 = vpop.f32.mrf.mxu0  ;;  %v1064_v29 = vadd.f32 %v1047_v40, %v981_v61  ;;  %v1490_v61 = vld [vmem:[#allocation2 + $0x10] sm:$0xf] }
 0x10a   : > { %v1339_v2 = vadd.f32 %v1319_v23, %v1145_v52  ;;  %v705_v23 = vadd.f32 %v3649_v56, %v622_v13  ;;  %v421_v56 = vadd.f32 %v3613_v31, %v3581_v10  ;;  %v3750_v10 = vld [vmem:[#allocation2 + $0x4] sm:$0x1]  ;;  %v1627_v31 = vshrl.u32 %v1609_v36, 16 }
 0x10b   : > { %v1891_v4 = vrot.slane %v3750_v10, 5 }
 0x10c   : > { %v1351_v33 = vadd.f32 %v3717_v45, %v1339_v2  ;;  %v788_v37 = vadd.f32 %v3640_v50, %v705_v23  ;;  %v623_v52 = vadd.f32 %v3623_v39, %v421_v56  ;;  %v1630_v50 = vshll.u32 %v1609_v36, 16  ;;  %v1862_v2 = vld [vmem:[#allocation2] sm:$0xe] }
 0x10d   : > { %v3148_v13 = vrot.slane %v1862_v2, 9  ;;  %v625_v23 = vadd.f32 %v3647_v55, %v426_v43  ;;  %v1636_v55 = vshll.u32 %v3750_v10, 16 }
 0x10e   : > { %v1359_v12 = vmax.f32 %v1351_v33, 0.0  ;;  %v706_v18 = vadd.f32 %v3655_v59, %v623_v52  ;;  %v982_v44 = vadd.f32 %v966_v63, %v788_v37  ;;  %v1632_v25 = vrot.slane %v1630_v50, 5  ;;  %v3130_v37 = vld [vmem:[#allocation2] sm:$0xf] }
 0x10f   : > { %v1127_v14 = vpop.f32.mrf.mxu3  ;;  %v624_v59 = vadd.f32 %v3636_v48, %v423_v26 }
 0x110   : > { %v1389_v20 = vpack.c.bf16 %v1359_v12, %v1359_v12  ;;  %v1146_v21 = vadd.f32 %v1127_v14, %v1063_v6  ;;  %v1324_v24 = vpop.f32.mrf.mxu0  ;;  %v3182_v6 = vld [vmem:[%s4192_s3 + $0x10] sm:$0xf]  ;;  %v1052_v12 = vpop.f32.mrf.mxu2  ;;  %v1629_v14 = vrot.slane %v1627_v31, 4  ;;  %v789_v48 = vadd.f32 %v3651_v57, %v706_v18 }
 0x111   : > { %v2224_v51 = vsel %vm1765_vm5, %v3182_v6, 0  ;;  %v1499_v6 = vld [vmem:[#allocation2 + $0x1c] sm:$0x1] }
 0x112   : > { %v1398_v49 = vshrl.u32 %v1389_v20, 16  ;;  %v1340_v32 = vadd.f32 %v1321_v53, %v1146_v21  ;;  %v1401_v16 = vshll.u32 %v1389_v20, 16  ;;  %2233 = vmatpush.bf16.msrb.mxu2 %v2224_v51 }
 0x114   : > { %v1400_v27 = vrot.slane %v1398_v49, 7  ;;  %v1352_v47 = vadd.f32 %v3717_v45, %v1340_v32  ;;  %v1065_v49 = vadd.f32 %v1049_v7, %v982_v44  ;;  %v3778_v32 = vpop.f32.mrf.mxu1 }
 0x116   : > { %v1403_v38 = vor.u32 %v1401_v16, %v1400_v27  ;;  %v1404_v41 = vrot.slane %v1400_v27, 4  ;;  %v1360_v42 = vmax.f32 %v1352_v47, 0.0  ;;  %v1493_v27 = vld [vmem:[#allocation2 + $0x14] sm:$0x1]  ;;  %v707_v16 = vadd.f32 %v3664_v3, %v624_v59 }
 0x117   : > { %v1130_v53 = vpop.f32.mrf.mxu3 }
 0x118   : > { %v1482_v54 = vsel %vm3734_vm10, %v1403_v38, %v1481_v46  ;;  %v1488_v0 = vsel %vm3743_vm11, %v1404_v41, %v1487_v17  ;;  %v1390_v40 = vpack.c.bf16 %v1360_v42, %v1360_v42  ;;  %v1147_v1 = vadd.f32 %v1130_v53, %v1064_v29  ;;  %v1326_v39 = vpop.f32.mrf.mxu0 }
 0x119   : > { %1483 = vst [vmem:[#allocation2 + $0x8] sm:$0xf] %v1482_v54  ;;  %v983_v41 = vadd.f32 %v3731_v34, %v789_v48  ;;  %v708_v42 = vadd.f32 %v3676_v8, %v625_v23  ;;  %v790_v10 = vadd.f32 %v3657_v60, %v707_v16  ;;  %v1638_v34 = vrot.slane %v1636_v55, 5 }
 0x11a   : > { %1489 = vst [vmem:[#allocation2 + $0xc] sm:$0x1] %v1488_v0  ;;  %v1406_v22 = vshrl.u32 %v1390_v40, 16  ;;  %v1341_v33 = vadd.f32 %v1324_v24, %v1147_v1  ;;  %v1409_v20 = vshll.u32 %v1390_v40, 16  ;;  %v3774_v24 = vadd.f32 %v3653_v58, %v3607_v28 }
 0x11b   : > { %v1892_v28 = vsel %vm3768_vm14, %v3148_v13, %v1891_v4  ;;  %v1633_v58 = vor.u32 %v1632_v25, %v1629_v14  ;;  %v1066_v60 = vadd.f32 %v1052_v12, %v983_v41  ;;  %v1496_v4 = vld [vmem:[#allocation2 + $0x18] sm:$0xf] }
 0x11c   : > { %v1408_v15 = vrot.slane %v1406_v22, 7  ;;  %v1353_v63 = vadd.f32 %v3717_v45, %v1341_v33  ;;  %v1923_v1 = vunpack.c.l.b16 %v1892_v28  ;;  %v1054_v33 = vpop.f32.mrf.mxu2 }
 0x11d   : > { %v1634_v43 = vrot.slane %v1633_v58, 4  ;;  %v984_v58 = vadd.f32 %v3778_v32, %v790_v10  ;;  %v1505_v32 = vld [vmem:[#allocation2 + $0x24] sm:$0x1] }
 0x11e   : > { %v1411_v47 = vor.u32 %v1409_v20, %v1408_v15  ;;  %v1412_v36 = vrot.slane %v1408_v15, 4  ;;  %v1361_v56 = vmax.f32 %v1353_v63, 0.0  ;;  %v974_v20 = vpop.f32.mrf.mxu1 }
 0x11f   : > { %v1132_v46 = vpop.f32.mrf.mxu3 }
 0x120   : > { %v1491_v57 = vsel %vm3734_vm10, %v1411_v47, %v1490_v61  ;;  %v1494_v7 = vsel %vm3743_vm11, %v1412_v36, %v1493_v27  ;;  %v1391_v17 = vpack.c.bf16 %v1361_v56, %v1361_v56  ;;  %v1148_v3 = vadd.f32 %v1132_v46, %v1065_v49  ;;  %v3270_v29 = vld [vmem:[#allocation2 + $0x4] sm:$0xf0]  ;;  %v1329_v40 = vpop.f32.mrf.mxu0 }
 0x121   : > { %v1863_v38 = vld [vmem:[#allocation2 + $0x8] sm:$0xe]  ;;  %1492 = vst [vmem:[#allocation2 + $0x10] sm:$0xf] %v1491_v57  ;;  %v3131_v26 = vor.u32 %v3270_v29, %v3130_v37  ;;  %v1619_v52 = vld [vmem:[#allocation2 + $0xc] sm:$0x1]  ;;  %v1639_v49 = vsel %vm3394_vm4, %v1634_v43, %v1638_v34  ;;  %v626_v56 = vadd.f32 %v3659_v62, %v3774_v24 }
 0x122   : > { %v3149_v53 = vrot.slane %v1863_v38, 9  ;;  %1495 = vst [vmem:[#allocation2 + $0x14] sm:$0x1] %v1494_v7  ;;  %v1414_v31 = vshrl.u32 %v1391_v17, 16  ;;  %v1342_v50 = vadd.f32 %v1326_v39, %v1148_v3  ;;  %v1895_v54 = vrot.slane %v1619_v52, 5 }
 0x123   : > { %v1417_v0 = vshll.u32 %v1391_v17, 16  ;;  %3144 = vmatmul.msk.bf16.vlgmr.msrb.gmra.mxu3 %vm1752_vm15, %v3131_v26  ;;  %v1610_v2 = vld [vmem:[#allocation2 + $0x8] sm:$0xf]  ;;  %v791_v39 = vadd.f32 %v3667_v5, %v708_v42  ;;  %v1650_v61 = vshll.u32 %v1619_v52, 16  ;;  %v1740_v41 = vunpack.c.l.b16 %v1639_v49 }
 0x124   : > { %v1416_v18 = vrot.slane %v1414_v31, 7  ;;  %v1354_v8 = vadd.f32 %v3717_v45, %v1342_v50  ;;  %v1896_v44 = vsel %vm3768_vm14, %v3149_v53, %v1895_v54  ;;  %v1641_v22 = vshrl.u32 %v1610_v2, 16  ;;  %v3164_v47 = vld [vmem:[#allocation2 + $0x8] sm:$0xf]  ;;  %v1502_v31 = vld [vmem:[#allocation2 + $0x20] sm:$0xf] }
 0x125   : > { %v1924_v13 = vunpack.c.l.b16 %v1896_v44  ;;  %v1644_v14 = vshll.u32 %v1610_v2, 16  ;;  %v985_v55 = vadd.f32 %v974_v20, %v791_v39  ;;  %v1652_v38 = vrot.slane %v1650_v61, 5 }
 0x126   : > { %v1419_v25 = vor.u32 %v1417_v0, %v1416_v18  ;;  %v1420_v51 = vrot.slane %v1416_v18, 4  ;;  %v1362_v59 = vmax.f32 %v1354_v8, 0.0  ;;  %v1643_v15 = vrot.slane %v1641_v22, 4  ;;  %v1057_v18 = vpop.f32.mrf.mxu2 }
 0x127   : > { %v1135_v63 = vpop.f32.mrf.mxu3  ;;  %v1931_v23 = vpack.c.b16 %v1924_v13, %v1923_v1  ;;  %v1646_v48 = vrot.slane %v1644_v14, 5  ;;  %v1067_v53 = vadd.f32 %v1054_v33, %v984_v58  ;;  %v709_v34 = vadd.f32 %v3692_v19, %v626_v56 }
 0x128   : > { %v1497_v12 = vsel %vm3734_vm10, %v1419_v25, %v1496_v4  ;;  %v1500_v5 = vsel %vm3743_vm11, %v1420_v51, %v1499_v6  ;;  %v1392_v27 = vpack.c.bf16 %v1362_v59, %v1362_v59  ;;  %v1149_v16 = vadd.f32 %v1135_v63, %v1066_v60  ;;  %v3274_v36 = vld [vmem:[#allocation2 + $0xc] sm:$0xf0]  ;;  %v1331_v10 = vpop.f32.mrf.mxu0 }
 0x129   : > { %1498 = vst [vmem:[#allocation2 + $0x18] sm:$0xf] %v1497_v12  ;;  %3157 = vmatmul.msk.bf16.vlgmr.msrb.gmra.mxu0 %vm1752_vm15, %v1931_v23  ;;  %v3165_v37 = vor.u32 %v3274_v36, %v3164_v47  ;;  %v1647_v46 = vor.u32 %v1646_v48, %v1643_v15  ;;  %v1864_v28 = vld [vmem:[#allocation2 + $0x10] sm:$0xe]  ;;  %v1620_v17 = vld [vmem:[#allocation2 + $0x14] sm:$0x1]  ;;  %v1068_v63 = vadd.f32 %v1057_v18, %v985_v55 }
 0x12a   : > { %1501 = vst [vmem:[#allocation2 + $0x1c] sm:$0x1] %v1500_v5  ;;  %v1422_v57 = vshrl.u32 %v1392_v27, 16  ;;  %v1343_v7 = vadd.f32 %v1329_v40, %v1149_v16  ;;  %v1425_v3 = vshll.u32 %v1392_v27, 16  ;;  %v1611_v62 = vld [vmem:[#allocation2 + $0x10] sm:$0xf] }
 0x12b   : > { %3178 = vmatmul.msk.bf16.vlgmr.msrb.gmra.mxu1 %vm1752_vm15, %v3165_v37  ;;  %v1648_v29 = vrot.slane %v1647_v46, 4  ;;  %v1655_v26 = vshrl.u32 %v1611_v62, 16  ;;  %v1658_v52 = vshll.u32 %v1611_v62, 16  ;;  %v3150_v54 = vrot.slane %v1864_v28, 9  ;;  %v3134_v13 = vld [vmem:[#allocation2 + $0x10] sm:$0xf] }
 0x12c   : > { %v1424_v24 = vrot.slane %v1422_v57, 7  ;;  %v1355_v42 = vadd.f32 %v3717_v45, %v1343_v7  ;;  %v1899_v0 = vrot.slane %v1620_v17, 5  ;;  %v1664_v60 = vshll.u32 %v1620_v17, 16  ;;  %v1508_v46 = vld [vmem:[#allocation2 + $0x28] sm:$0xf] }
 0x12d   : > { %v1653_v50 = vsel %vm3394_vm4, %v1648_v29, %v1652_v38  ;;  %v1657_v44 = vrot.slane %v1655_v26, 4  ;;  %v1660_v22 = vrot.slane %v1658_v52, 5  ;;  %v1511_v28 = vld [vmem:[#allocation2 + $0x2c] sm:$0x1] }
 0x12e   : > { %v1427_v40 = vor.u32 %v1425_v3, %v1424_v24  ;;  %v1428_v1 = vrot.slane %v1424_v24, 4  ;;  %v1363_v2 = vmax.f32 %v1355_v42, 0.0  ;;  %v1741_v43 = vunpack.c.l.b16 %v1653_v50 }
 0x12f   : > { %v1137_v8 = vpop.f32.mrf.mxu3  ;;  %v1661_v20 = vor.u32 %v1660_v22, %v1657_v44  ;;  %v1900_v49 = vsel %vm3768_vm14, %v3150_v54, %v1899_v0  ;;  %v1666_v16 = vrot.slane %v1664_v60, 5  ;;  %v1059_v60 = vpop.f32.mrf.mxu2 }
 0x130   : > { %v1503_v33 = vsel %vm3734_vm10, %v1427_v40, %v1502_v31  ;;  %v1506_v39 = vsel %vm3743_vm11, %v1428_v1, %v1505_v32  ;;  %v1393_v4 = vpack.c.bf16 %v1363_v2, %v1363_v2  ;;  %v1748_v6 = vpack.c.b16 %v1741_v43, %v1740_v41  ;;  %v3271_v14 = vld [vmem:[#allocation2 + $0x14] sm:$0xf0]  ;;  %v1334_v24 = vpop.f32.mrf.mxu0  ;;  %v976_v40 = vpop.f32.mrf.mxu1 }
 0x131   : > { %v1865_v25 = vld [vmem:[#allocation2 + $0x18] sm:$0xe]  ;;  %1504 = vst [vmem:[#allocation2 + $0x20] sm:$0xf] %v1503_v33  ;;  %v1150_v51 = vadd.f32 %v1137_v8, %v1067_v53  ;;  %v3135_v59 = vor.u32 %v3271_v14, %v3134_v13  ;;  %v1621_v19 = vld [vmem:[#allocation2 + $0x1c] sm:$0x1]  ;;  %v1925_v55 = vunpack.c.l.b16 %v1900_v49  ;;  %v792_v41 = vadd.f32 %v3679_v9, %v709_v34 }
 0x132   : > { %v3151_v15 = vrot.slane %v1865_v25, 9  ;;  %1507 = vst [vmem:[#allocation2 + $0x24] sm:$0x1] %v1506_v39  ;;  %v1430_v23 = vshrl.u32 %v1393_v4, 16  ;;  %3124 = vmatmul.msk.bf16.vlgmr.msra.gmra.mxu2 %vm1752_vm15, %v1748_v6  ;;  %v1903_v48 = vrot.slane %v1621_v19, 5  ;;  %v1433_v61 = vshll.u32 %v1393_v4, 16 }
 0x133   : > { %v1344_v12 = vadd.f32 %v1331_v10, %v1150_v51  ;;  %3145 = vmatmul.msk.bf16.gmra.mxu3 %vm1752_vm15, %v3135_v59  ;;  %v1612_v5 = vld [vmem:[#allocation2 + $0x18] sm:$0xf]  ;;  %v1662_v27 = vrot.slane %v1661_v20, 4  ;;  %v1678_v7 = vshll.u32 %v1621_v19, 16  ;;  %v986_v6 = vadd.f32 %v976_v40, %v792_v41 }
 0x134   : > { %v1432_v47 = vrot.slane %v1430_v23, 7  ;;  %v1904_v36 = vsel %vm3768_vm14, %v3151_v15, %v1903_v48  ;;  %v1669_v56 = vshrl.u32 %v1612_v5, 16  ;;  %v1672_v37 = vshll.u32 %v1612_v5, 16  ;;  %v3168_v10 = vld [vmem:[#allocation2 + $0x18] sm:$0xf] }
 0x135   : > { %v1356_v58 = vadd.f32 %v3717_v45, %v1344_v12  ;;  %v1926_v57 = vunpack.c.l.b16 %v1904_v36  ;;  %v1667_v52 = vsel %vm3394_vm4, %v1662_v27, %v1666_v16  ;;  %v1680_v2 = vrot.slane %v1678_v7, 5  ;;  %v1517_v23 = vld [vmem:[#allocation2 + $0x34] sm:$0x1] }
 0x136   : > { %v1435_v17 = vor.u32 %v1433_v61, %v1432_v47  ;;  %v1436_v3 = vrot.slane %v1432_v47, 4  ;;  %v1671_v29 = vrot.slane %v1669_v56, 4  ;;  %v1674_v38 = vrot.slane %v1672_v37, 5 }
 0x137   : > { %v1364_v62 = vmax.f32 %v1356_v58, 0.0  ;;  %v1140_v42 = vpop.f32.mrf.mxu3  ;;  %v1932_v26 = vpack.c.b16 %v1926_v57, %v1925_v55  ;;  %v1742_v25 = vunpack.c.l.b16 %v1667_v52  ;;  %v1069_v20 = vadd.f32 %v1059_v60, %v986_v6 }
 0x138   : > { %v1509_v53 = vsel %vm3734_vm10, %v1435_v17, %v1508_v46  ;;  %v1512_v31 = vsel %vm3743_vm11, %v1436_v3, %v1511_v28  ;;  %v1151_v32 = vadd.f32 %v1140_v42, %v1068_v63  ;;  %v3275_v50 = vld [vmem:[#allocation2 + $0x1c] sm:$0xf0]  ;;  %v1675_v54 = vor.u32 %v1674_v38, %v1671_v29  ;;  %v1514_v63 = vld [vmem:[#allocation2 + $0x30] sm:$0xf]  ;;  %v1336_v7 = vpop.f32.mrf.mxu0 }
 0x139   : > { %v1866_v0 = vld [vmem:[#allocation2 + $0x20] sm:$0xe]  ;;  %1510 = vst [vmem:[#allocation2 + $0x28] sm:$0xf] %v1509_v53  ;;  %v1394_v9 = vpack.c.bf16 %v1364_v62, %v1364_v62  ;;  %3158 = vmatmul.msk.bf16.gmra.mxu0 %vm1752_vm15, %v1932_v26  ;;  %v3169_v1 = vor.u32 %v3275_v50, %v3168_v10  ;;  %v1622_v43 = vld [vmem:[#allocation2 + $0x24] sm:$0x1] }
 0x13a   : > { %v3152_v34 = vrot.slane %v1866_v0, 9  ;;  %1513 = vst [vmem:[#allocation2 + $0x2c] sm:$0x1] %v1512_v31  ;;  %v1345_v18 = vadd.f32 %v1334_v24, %v1151_v32  ;;  %v1676_v8 = vrot.slane %v1675_v54, 4  ;;  %v1907_v44 = vrot.slane %v1622_v43, 5 }
 0x13b   : > { %v1613_v22 = vld [vmem:[#allocation2 + $0x20] sm:$0xf]  ;;  %v1438_v33 = vshrl.u32 %v1394_v9, 16  ;;  %3179 = vmatmul.msk.bf16.gmra.mxu1 %vm1752_vm15, %v3169_v1  ;;  %v1441_v59 = vshll.u32 %v1394_v9, 16  ;;  %v1692_v47 = vshll.u32 %v1622_v43, 16 }
 0x13c   : > { %v1683_v39 = vshrl.u32 %v1613_v22, 16  ;;  %v1686_v4 = vshll.u32 %v1613_v22, 16  ;;  %v1357_v13 = vadd.f32 %v3717_v45, %v1345_v18  ;;  %v1681_v14 = vsel %vm3394_vm4, %v1676_v8, %v1680_v2  ;;  %v3138_v37 = vld [vmem:[#allocation2 + $0x20] sm:$0xf]  ;;  %v1520_v26 = vld [vmem:[#allocation2 + $0x38] sm:$0xf] }
 0x13d   : > { %v1440_v51 = vrot.slane %v1438_v33, 7  ;;  %v1743_v19 = vunpack.c.l.b16 %v1681_v14  ;;  %v1908_v48 = vsel %vm3768_vm14, %v3152_v34, %v1907_v44  ;;  %v1694_v53 = vrot.slane %v1692_v47, 5  ;;  %v1523_v54 = vld [vmem:[#allocation2 + $0x3c] sm:$0x1]  ;;  %v3195_v9 = vld [vmem:[%s4192_s3 + $0x14] sm:$0xf] }
 0x13e   : > { %v1685_v15 = vrot.slane %v1683_v39, 4  ;;  %v1365_v49 = vmax.f32 %v1357_v13, 0.0  ;;  %v1688_v61 = vrot.slane %v1686_v4, 5  ;;  %v1927_v42 = vunpack.c.l.b16 %v1908_v48  ;;  %v3200_v18 = vld [vmem:[%s4192_s3 + $0x18] sm:$0xf] }
 0x13f   : > { %v1443_v12 = vor.u32 %v1441_v59, %v1440_v51  ;;  %v1444_v5 = vrot.slane %v1440_v51, 4  ;;  %v1749_v27 = vpack.c.b16 %v1743_v19, %v1742_v25  ;;  %v1142_v16 = vpop.f32.mrf.mxu3  ;;  %v2346_v39 = vsel %vm1765_vm5, %v3195_v9, 0  ;;  %v3858_v25 = vld [vmem:[#allocation2 + $0x8] sm:$0xe]  ;;  %v3864_v48 = vld [vmem:[#allocation2 + $0x14] sm:$0x1] }
 0x140   : > { %v1395_v36 = vpack.c.bf16 %v1365_v49, %v1365_v49  ;;  %v1152_v56 = vadd.f32 %v1142_v16, %v1069_v20  ;;  %v3272_v46 = vld [vmem:[#allocation2 + $0x24] sm:$0xf0]  ;;  %v1689_v58 = vor.u32 %v1688_v61, %v1685_v15  ;;  %2355 = vmatpush.bf16.msra.mxu3 %v2346_v39  ;;  %v2429_v51 = vsel %vm1765_vm5, %v3200_v18, 0  ;;  %v3862_v20 = vld [vmem:[#allocation2 + $0xc] sm:$0x1] }
 0x141   : > { %v1867_v28 = vld [vmem:[#allocation2 + $0x28] sm:$0xe]  ;;  %v1515_v55 = vsel %vm3734_vm10, %v1443_v12, %v1514_v63  ;;  %v1518_v57 = vsel %vm3743_vm11, %v1444_v5, %v1517_v23  ;;  %v3139_v17 = vor.u32 %v3272_v46, %v3138_v37  ;;  %v1623_v3 = vld [vmem:[#allocation2 + $0x2c] sm:$0x1]  ;;  %v3866_v61 = vld [vmem:[#allocation2 + $0x10] sm:$0xe]  ;;  %2438 = vmatpush.bf16.msra.mxu0 %v2429_v51 }
 0x142   : > { %v3153_v29 = vrot.slane %v1867_v28, 9  ;;  %v1614_v38 = vld [vmem:[#allocation2 + $0x28] sm:$0xf]  ;;  %1516 = vst [vmem:[#allocation2 + $0x30] sm:$0xf] %v1515_v55  ;;  %v1446_v41 = vshrl.u32 %v1395_v36, 16  ;;  %3125 = vmatmul.msk.bf16.gmra.mxu2 %vm1752_vm15, %v1749_v27  ;;  %v1346_v62 = vadd.f32 %v1336_v7, %v1152_v56 }
 0x143   : > { %v1911_v24 = vrot.slane %v1623_v3, 5  ;;  %1519 = vst [vmem:[#allocation2 + $0x34] sm:$0x1] %v1518_v57  ;;  %3146 = vmatmul.msk.bf16.gmra.mxu3 %vm1752_vm15, %v3139_v17  ;;  %v1690_v52 = vrot.slane %v1689_v58, 4  ;;  %v1697_v31 = vshrl.u32 %v1614_v38, 16  ;;  %v1700_v32 = vshll.u32 %v1614_v38, 16 }
 0x144   : > { %v1448_v10 = vrot.slane %v1446_v41, 7  ;;  %v1449_v50 = vshll.u32 %v1395_v36, 16  ;;  %v1358_v0 = vadd.f32 %v3717_v45, %v1346_v62  ;;  %v1706_v34 = vshll.u32 %v1623_v3, 16  ;;  %v3172_v14 = vld [vmem:[#allocation2 + $0x28] sm:$0xf] }
 0x145   : > { %v1912_v40 = vsel %vm3768_vm14, %v3153_v29, %v1911_v24  ;;  %v1699_v2 = vrot.slane %v1697_v31, 4  ;;  %v1702_v43 = vrot.slane %v1700_v32, 5  ;;  %v1695_v45 = vsel %vm3394_vm4, %v1690_v52, %v1694_v53  ;;  %v1526_v12 = vld [vmem:[#allocation2 + $0x40] sm:$0xf]  ;;  %v3221_v58 = vld [vmem:[%s4192_s3 + $0x1c] sm:$0xf] }
 0x146   : > { %v1928_v1 = vunpack.c.l.b16 %v1912_v40  ;;  %v1451_v8 = vor.u32 %v1449_v50, %v1448_v10  ;;  %v1452_v44 = vrot.slane %v1448_v10, 4  ;;  %v1366_v22 = vmax.f32 %v1358_v0, 0.0  ;;  %v1529_v55 = vld [vmem:[#allocation2 + $0x44] sm:$0x1]  ;;  %v2468_v24 = vld [vmem:[#allocation2 + $0x10] sm:$0xf] }
 0x147   : > { %v1703_v33 = vor.u32 %v1702_v43, %v1699_v2  ;;  %v1708_v15 = vrot.slane %v1706_v34, 5  ;;  %v1744_v27 = vunpack.c.l.b16 %v1695_v45  ;;  %v3187_v17 = vrot.slane %v3858_v25, 9  ;;  %v2470_v31 = vld [vmem:[#allocation2 + $0x18] sm:$0xf] }
 0x148   : > { %v1933_v60 = vpack.c.b16 %v1928_v1, %v1927_v42  ;;  %v1521_v4 = vsel %vm3734_vm10, %v1451_v8, %v1520_v26  ;;  %v1524_v6 = vsel %vm3743_vm11, %v1452_v44, %v1523_v54  ;;  %v1396_v13 = vpack.c.bf16 %v1366_v22, %v1366_v22 }
 0x149   : > { %1522 = vst [vmem:[#allocation2 + $0x38] sm:$0xf] %v1521_v4  ;;  %v3276_v59 = vld [vmem:[#allocation2 + $0x2c] sm:$0xf0]  ;;  %v1704_v19 = vrot.slane %v1703_v33, 4  ;;  %v2623_v3 = vsel %vm1765_vm5, %v3221_v58, 0 }
 0x14a   : > { %3159 = vmatmul.msk.bf16.gmra.mxu0 %vm1752_vm15, %v1933_v60  ;;  %1525 = vst [vmem:[#allocation2 + $0x3c] sm:$0x1] %v1524_v6  ;;  %v1454_v63 = vshrl.u32 %v1396_v13, 16  ;;  %v1457_v23 = vshll.u32 %v1396_v13, 16  ;;  %v3173_v49 = vor.u32 %v3276_v59, %v3172_v14  ;;  %v1624_v16 = vld [vmem:[#allocation2 + $0x34] sm:$0x1]  ;;  %2632 = vmatpush.bf16.msra.mxu1 %v2623_v3 }
 0x14b   : > { %v1709_v5 = vsel %vm3394_vm4, %v1704_v19, %v1708_v15  ;;  %v1868_v47 = vld [vmem:[#allocation2 + $0x30] sm:$0xe]  ;;  %v1915_v28 = vrot.slane %v1624_v16, 5  ;;  %v2289_v62 = vrot.slane %v3862_v20, 5  ;;  %v3188_v52 = vrot.slane %v3866_v61, 9 }
 0x14c   : > { %v1615_v36 = vld [vmem:[#allocation2 + $0x30] sm:$0xf]  ;;  %v1456_v56 = vrot.slane %v1454_v63, 7  ;;  %3180 = vmatmul.msk.bf16.gmra.mxu1 %vm1752_vm15, %v3173_v49  ;;  %v1745_v37 = vunpack.c.l.b16 %v1709_v5  ;;  %v3154_v46 = vrot.slane %v1868_v47, 9  ;;  %v2293_v53 = vrot.slane %v3864_v48, 5 }
 0x14d   : > { %v1711_v57 = vshrl.u32 %v1615_v36, 16  ;;  %v1714_v7 = vshll.u32 %v1615_v36, 16  ;;  %v3142_v50 = vld [vmem:[#allocation2 + $0x30] sm:$0xf]  ;;  %v2485_v34 = vshrl.u32 %v2468_v24, 16  ;;  %v2488_v8 = vshll.u32 %v2468_v24, 16 }
 0x14e   : > { %v1459_v29 = vor.u32 %v1457_v23, %v1456_v56  ;;  %v1460_v38 = vrot.slane %v1456_v56, 4  ;;  %v1750_v41 = vpack.c.b16 %v1745_v37, %v1744_v27  ;;  %v1916_v40 = vsel %vm3768_vm14, %v3154_v46, %v1915_v28  ;;  %v2071_v63 = vld [vmem:[#allocation2 + $0x10] sm:$0xf]  ;;  %v2069_v5 = vld [vmem:[#allocation2 + $0x8] sm:$0xf] }
 0x14f   : > { %v1713_v42 = vrot.slane %v1711_v57, 4  ;;  %v1716_v26 = vrot.slane %v1714_v7, 5  ;;  %v1929_v11 = vunpack.c.l.b16 %v1916_v40  ;;  %v1720_v44 = vshll.u32 %v1624_v16, 16  ;;  %v3234_v58 = vld [vmem:[%s4192_s3 + $0x20] sm:$0xf] }
 0x150   : > { %v1527_v32 = vsel %vm3734_vm10, %v1459_v29, %v1526_v12  ;;  %v1530_v10 = vsel %vm3743_vm11, %v1460_v38, %v1529_v55  ;;  %v3273_v54 = vld [vmem:[#allocation2 + $0x34] sm:$0xf0]  ;;  %v2499_v39 = vshrl.u32 %v2470_v31, 16  ;;  %v2502_v4 = vshll.u32 %v2470_v31, 16  ;;  %v3889_v12 = vld [vmem:[#allocation2 + $0x14] sm:$0x1] }
 0x151   : > { %v1869_v0 = vld [vmem:[#allocation2 + $0x38] sm:$0xe]  ;;  %1528 = vst [vmem:[#allocation2 + $0x40] sm:$0xf] %v1527_v32  ;;  %v3143_v9 = vor.u32 %v3273_v54, %v3142_v50  ;;  %v1625_v1 = vld [vmem:[#allocation2 + $0x3c] sm:$0x1]  ;;  %v1717_v43 = vor.u32 %v1716_v26, %v1713_v42  ;;  %v2290_v36 = vsel %vm3768_vm14, %v3187_v17, %v2289_v62  ;;  %v2294_v55 = vsel %vm3768_vm14, %v3188_v52, %v2293_v53 }
 0x152   : > { %v3155_v2 = vrot.slane %v1869_v0, 9  ;;  %1531 = vst [vmem:[#allocation2 + $0x44] sm:$0x1] %v1530_v10  ;;  %3126 = vmatmul.msk.bf16.gmra.mxu2 %vm1752_vm15, %v1750_v41  ;;  %v1919_v30 = vrot.slane %v1625_v1, 5  ;;  %v1616_v18 = vld [vmem:[#allocation2 + $0x38] sm:$0xf]  ;;  %v2322_v52 = vunpack.c.l.b16 %v2294_v55  ;;  %v2321_v54 = vunpack.c.l.b16 %v2290_v36 }
 0x153   : > { %3147 = vmatmul.msk.bf16.gmra.mxu3 %vm1752_vm15, %v3143_v9  ;;  %v1725_v22 = vshrl.u32 %v1616_v18, 16  ;;  %v1728_v60 = vshll.u32 %v1616_v18, 16  ;;  %v1734_v33 = vshll.u32 %v1625_v1, 16  ;;  %v1718_v13 = vrot.slane %v1717_v43, 4  ;;  %v3176_v27 = vld [vmem:[#allocation2 + $0x38] sm:$0xf] }
 0x154   : > { %v1920_v45 = vsel %vm3768_vm14, %v3155_v2, %v1919_v30  ;;  %v2487_v51 = vrot.slane %v2485_v34, 4  ;;  %v2490_v59 = vrot.slane %v2488_v8, 5  ;;  %v2501_v19 = vrot.slane %v2499_v39, 4  ;;  %v3901_v57 = vld [vmem:[#allocation2 + $0x1c] sm:$0x1] }
 0x155   : > { %v1930_v6 = vunpack.c.l.b16 %v1920_v45  ;;  %v1727_v14 = vrot.slane %v1725_v22, 4  ;;  %v1730_v25 = vrot.slane %v1728_v60, 5  ;;  %v2504_v15 = vrot.slane %v2502_v4, 5  ;;  %v2472_v1 = vld [vmem:[#allocation2 + $0x20] sm:$0xf] }
 0x156   : > { %v1722_v49 = vrot.slane %v1720_v44, 5  ;;  %v1736_v47 = vrot.slane %v1734_v33, 5  ;;  %v2100_v28 = vshrl.u32 %v2071_v63, 16  ;;  %v2491_v7 = vor.u32 %v2490_v59, %v2487_v51  ;;  %v2474_v34 = vld [vmem:[#allocation2 + $0x28] sm:$0xf] }
 0x157   : > { %v1934_v23 = vpack.c.b16 %v1930_v6, %v1929_v11  ;;  %v1731_v61 = vor.u32 %v1730_v25, %v1727_v14  ;;  %v2494_v17 = vshll.u32 %v3889_v12, 16  ;;  %v2505_v3 = vor.u32 %v2504_v15, %v2501_v19  ;;  %v3909_v8 = vld [vmem:[#allocation2 + $0x24] sm:$0x1]  ;;  %v2266_v11 = vld [vmem:[#allocation2 + $0x20] sm:$0xe] }
 0x158   : > { %v3277_v16 = vld [vmem:[#allocation2 + $0x3c] sm:$0xf0]  ;;  %v1723_v37 = vsel %vm3394_vm4, %v1718_v13, %v1722_v49  ;;  %v2086_v38 = vshrl.u32 %v2069_v5, 16  ;;  %v2089_v41 = vshll.u32 %v2069_v5, 16  ;;  %v2103_v62 = vshll.u32 %v2071_v63, 16 }
 0x159   : > { %v3177_v56 = vor.u32 %v3277_v16, %v3176_v27  ;;  %v1732_v46 = vrot.slane %v1731_v61, 4  ;;  %v1746_v24 = vunpack.c.l.b16 %v1723_v37  ;;  %v2102_v26 = vrot.slane %v2100_v28, 4  ;;  %v3278_v44 = vld [vmem:[#allocation2 + $0x14] sm:$0xf0]  ;;  %v3203_v39 = vld [vmem:[#allocation2 + $0x10] sm:$0xf] }
 0x15a   : > { %3160 = vmatmul.msk.bf16.gmra.mxu0 %vm1752_vm15, %v1934_v23  ;;  %v2745_v31 = vsel %vm1765_vm5, %v3234_v58, 0  ;;  %v2508_v53 = vshll.u32 %v3901_v57, 16  ;;  %v2105_v32 = vrot.slane %v2103_v62, 5  ;;  %v2492_v50 = vrot.slane %v2491_v7, 4  ;;  %v3918_v13 = vld [vmem:[#allocation2 + $0x1c] sm:$0x1] }
 0x15b   : > { %v1737_v29 = vsel %vm3394_vm4, %v1732_v46, %v1736_v47  ;;  %2754 = vmatpush.bf16.msra.mxu2 %v2745_v31  ;;  %v2506_v0 = vrot.slane %v2505_v3, 4  ;;  %v2088_v40 = vrot.slane %v2086_v38, 4  ;;  %v2091_v9 = vrot.slane %v2089_v41, 5  ;;  %v2265_v14 = vld [vmem:[#allocation2 + $0x18] sm:$0xe] }
 0x15c   : > { %3181 = vmatmul.msk.bf16.gmra.mxu1 %vm1752_vm15, %v3177_v56  ;;  %v1747_v42 = vunpack.c.l.b16 %v1737_v29  ;;  %v2496_v2 = vrot.slane %v2494_v17, 5  ;;  %v2106_v43 = vor.u32 %v2105_v32, %v2102_v26  ;;  %v2329_v30 = vpack.c.b16 %v2322_v52, %v2321_v54  ;;  %v2075_v63 = vld [vmem:[#allocation2 + $0x20] sm:$0xf]  ;;  %v2073_v27 = vld [vmem:[#allocation2 + $0x18] sm:$0xf] }
 0x15d   : > { %v2510_v18 = vrot.slane %v2508_v53, 5  ;;  %v2109_v60 = vshll.u32 %v3864_v48, 16  ;;  %v2513_v45 = vshrl.u32 %v2472_v1, 16  ;;  %v2516_v33 = vshll.u32 %v2472_v1, 16  ;;  %v3925_v7 = vld [vmem:[#allocation2 + $0x24] sm:$0x1] }
 0x15e   : > { %v1751_v10 = vpack.c.b16 %v1747_v42, %v1746_v24  ;;  %v2497_v22 = vsel %vm3394_vm4, %v2492_v50, %v2496_v2  ;;  %v2092_v6 = vor.u32 %v2091_v9, %v2088_v40  ;;  %v2527_v25 = vshrl.u32 %v2474_v34, 16  ;;  %v3927_v17 = vld [vmem:[#allocation2 + $0x2c] sm:$0x1]  ;;  %v2476_v2 = vld [vmem:[#allocation2 + $0x30] sm:$0xf] }
 0x15f   : > { %v2511_v4 = vsel %vm3394_vm4, %v2506_v0, %v2510_v18  ;;  %v2530_v51 = vshll.u32 %v2474_v34, 16  ;;  %v2095_v59 = vshll.u32 %v3862_v20, 16  ;;  %v2107_v19 = vrot.slane %v2106_v43, 4  ;;  %v3207_v34 = vld [vmem:[#allocation2 + $0x20] sm:$0xf] }
 0x160   : > { %v3190_v15 = vrot.slane %v2266_v11, 9  ;;  %v2301_v48 = vrot.slane %v3909_v8, 5  ;;  %v2515_v23 = vrot.slane %v2513_v45, 4  ;;  %v2518_v49 = vrot.slane %v2516_v33, 5  ;;  %v2267_v45 = vld [vmem:[#allocation2 + $0x28] sm:$0xe] }
 0x161   : > { %v2529_v61 = vrot.slane %v2527_v25, 4  ;;  %v2532_v5 = vrot.slane %v2530_v51, 5  ;;  %v3204_v16 = vor.u32 %v3278_v44, %v3203_v39  ;;  %v2599_v47 = vunpack.c.l.b16 %v2511_v4  ;;  %v2478_v33 = vld [vmem:[#allocation2 + $0x38] sm:$0xf]  ;;  %v2077_v25 = vld [vmem:[#allocation2 + $0x28] sm:$0xf] }
 0x162   : > { %3127 = vmatmul.msk.bf16.gmra.mxu2 %vm1752_vm15, %v1751_v10  ;;  %v3189_v36 = vrot.slane %v2265_v14, 9  ;;  %v2297_v56 = vrot.slane %v3918_v13, 5  ;;  %v2093_v37 = vrot.slane %v2092_v6, 4  ;;  %v2111_v46 = vrot.slane %v2109_v60, 5  ;;  %v3936_v10 = vld [vmem:[#allocation2 + $0x24] sm:$0xf0] }
 0x163   : > { %3196 = vmatmul.msk.bf16.vlgmr.msra.gmra.mxu3 %vm1752_vm15, %v2329_v30  ;;  %v2128_v28 = vshrl.u32 %v2075_v63, 16  ;;  %v2131_v58 = vshll.u32 %v2075_v63, 16  ;;  %v2598_v20 = vunpack.c.l.b16 %v2497_v22  ;;  %v2302_v55 = vsel %vm3768_vm14, %v3190_v15, %v2301_v48  ;;  %v3948_v63 = vld [vmem:[#allocation2 + $0x2c] sm:$0x1] }
 0x164   : > { %v2114_v3 = vshrl.u32 %v2073_v27, 16  ;;  %v2117_v29 = vshll.u32 %v2073_v27, 16  ;;  %v2097_v38 = vrot.slane %v2095_v59, 5  ;;  %v2112_v41 = vsel %vm3394_vm4, %v2107_v19, %v2111_v46 }
 0x165   : > { %v2519_v62 = vor.u32 %v2518_v49, %v2515_v23  ;;  %v2533_v24 = vor.u32 %v2532_v5, %v2529_v61  ;;  %v2606_v42 = vpack.c.b16 %v2599_v47, %v2598_v20  ;;  %v2298_v26 = vsel %vm3768_vm14, %v3189_v36, %v2297_v56  ;;  %v3952_v36 = vld [vmem:[#allocation2 + $0x34] sm:$0x1] }
 0x166   : > { %v2130_v31 = vrot.slane %v2128_v28, 4  ;;  %v2133_v52 = vrot.slane %v2131_v58, 5  ;;  %v2098_v53 = vsel %vm3394_vm4, %v2093_v37, %v2097_v38  ;;  %v2324_v32 = vunpack.c.l.b16 %v2302_v55 }
 0x167   : > { %v2522_v50 = vshll.u32 %v3925_v7, 16  ;;  %v2536_v54 = vshll.u32 %v3927_v17, 16  ;;  %v2200_v0 = vunpack.c.l.b16 %v2112_v41  ;;  %v2116_v40 = vrot.slane %v2114_v3, 4  ;;  %v3955_v3 = vld [vmem:[#allocation2 + $0x3c] sm:$0x1] }
 0x168   : > { %v2119_v9 = vrot.slane %v2117_v29, 5  ;;  %v2123_v1 = vshll.u32 %v3918_v13, 16  ;;  %v2323_v43 = vunpack.c.l.b16 %v2298_v26  ;;  %v2520_v30 = vrot.slane %v2519_v62, 4 }
 0x169   : > { %v2534_v18 = vrot.slane %v2533_v24, 4  ;;  %v2199_v11 = vunpack.c.l.b16 %v2098_v53  ;;  %v3208_v44 = vor.u32 %v3936_v10, %v3207_v34  ;;  %v2134_v22 = vor.u32 %v2133_v52, %v2130_v31  ;;  %v3960_v31 = vld [vmem:[#allocation2 + $0x34] sm:$0x1] }
 0x16a   : > { %3217 = vmatmul.msk.bf16.vlgmr.msra.gmra.mxu0 %vm1752_vm15, %v3204_v16  ;;  %v2137_v60 = vshll.u32 %v3909_v8, 16  ;;  %v2330_v39 = vpack.c.b16 %v2324_v32, %v2323_v43  ;;  %v2524_v4 = vrot.slane %v2522_v50, 5  ;;  %v2538_v6 = vrot.slane %v2536_v54, 5  ;;  %v2268_v8 = vld [vmem:[#allocation2 + $0x30] sm:$0xe] }
 0x16b   : > { %v2541_v14 = vshrl.u32 %v2476_v2, 16  ;;  %v2207_v51 = vpack.c.b16 %v2200_v0, %v2199_v11  ;;  %v2120_v13 = vor.u32 %v2119_v9, %v2116_v40  ;;  %v2125_v59 = vrot.slane %v2123_v1, 5  ;;  %v2079_v16 = vld [vmem:[#allocation2 + $0x30] sm:$0xf] }
 0x16c   : > { %3222 = vmatmul.msk.bf16.vlgmr.msra.gmra.mxu1 %vm1752_vm15, %v2606_v42  ;;  %v2544_v19 = vshll.u32 %v2476_v2, 16  ;;  %v2525_v15 = vsel %vm3394_vm4, %v2520_v30, %v2524_v4  ;;  %v2539_v48 = vsel %vm3394_vm4, %v2534_v18, %v2538_v6  ;;  %v2555_v23 = vshrl.u32 %v2478_v33, 16  ;;  %v2480_v6 = vld [vmem:[#allocation2 + $0x40] sm:$0xf] }
 0x16d   : > { %v2558_v49 = vshll.u32 %v2478_v33, 16  ;;  %v2135_v61 = vrot.slane %v2134_v22, 4  ;;  %v2139_v5 = vrot.slane %v2137_v60, 5  ;;  %v3191_v27 = vrot.slane %v2267_v45, 9  ;;  %v3971_v45 = vld [vmem:[#allocation2 + $0x44] sm:$0x1] }
 0x16e   : > { %v2142_v47 = vshrl.u32 %v2077_v25, 16  ;;  %v2543_v56 = vrot.slane %v2541_v14, 4  ;;  %v2546_v37 = vrot.slane %v2544_v19, 5  ;;  %v2557_v46 = vrot.slane %v2555_v23, 4  ;;  %v2269_v19 = vld [vmem:[#allocation2 + $0x38] sm:$0xe] }
 0x16f   : > { %v2560_v28 = vrot.slane %v2558_v49, 5  ;;  %v2601_v58 = vunpack.c.l.b16 %v2539_v48  ;;  %v2121_v20 = vrot.slane %v2120_v13, 4  ;;  %v2305_v55 = vrot.slane %v3948_v63, 5  ;;  %v2482_v49 = vld [vmem:[#allocation2 + $0x48] sm:$0xf] }
 0x170   : > { %v2145_v29 = vshll.u32 %v2077_v25, 16  ;;  %v3192_v38 = vrot.slane %v2268_v8, 9  ;;  %v2156_v62 = vshrl.u32 %v2079_v16, 16  ;;  %v2159_v24 = vshll.u32 %v2079_v16, 16 }
 0x171   : > { %v2561_v41 = vor.u32 %v2560_v28, %v2557_v46  ;;  %v2140_v42 = vsel %vm3394_vm4, %v2135_v61, %v2139_v5  ;;  %v2309_v26 = vrot.slane %v3952_v36, 5  ;;  %v2144_v52 = vrot.slane %v2142_v47, 4  ;;  %v3280_v46 = vld [vmem:[#allocation2 + $0x34] sm:$0xf0] }
 0x172   : > { %3183 = vmatmul.msk.bf16.vlgmr.msrb.gmra.mxu2 %vm1752_vm15, %v2207_v51  ;;  %v2147_v53 = vrot.slane %v2145_v29, 5  ;;  %v2547_v32 = vor.u32 %v2546_v37, %v2543_v56  ;;  %v2564_v10 = vshll.u32 %v3955_v3, 16  ;;  %v2158_v50 = vrot.slane %v2156_v62, 4  ;;  %v3211_v62 = vld [vmem:[#allocation2 + $0x30] sm:$0xf] }
 0x173   : > { %3197 = vmatmul.msk.bf16.gmra.mxu3 %vm1752_vm15, %v2330_v39  ;;  %v2161_v54 = vrot.slane %v2159_v24, 5  ;;  %v2600_v0 = vunpack.c.l.b16 %v2525_v15  ;;  %v2126_v40 = vsel %vm3394_vm4, %v2121_v20, %v2125_v59  ;;  %v2306_v9 = vsel %vm3768_vm14, %v3191_v27, %v2305_v55  ;;  %v3978_v59 = vld [vmem:[#allocation2 + $0x3c] sm:$0x1] }
 0x174   : > { %v2550_v1 = vshll.u32 %v3960_v31, 16  ;;  %v2562_v2 = vrot.slane %v2561_v41, 4  ;;  %v2202_v34 = vunpack.c.l.b16 %v2140_v42  ;;  %v2310_v30 = vsel %vm3768_vm14, %v3192_v38, %v2309_v26  ;;  %v2662_v41 = vld [vmem:[#allocation2 + $0x10] sm:$0xe] }
 0x175   : > { %v2607_v43 = vpack.c.b16 %v2601_v58, %v2600_v0  ;;  %v2148_v18 = vor.u32 %v2147_v53, %v2144_v52  ;;  %v2548_v11 = vrot.slane %v2547_v32, 4  ;;  %v2566_v22 = vrot.slane %v2564_v10, 5  ;;  %v2663_v52 = vld [vmem:[#allocation2 + $0x18] sm:$0xe] }
 0x176   : > { %v2162_v60 = vor.u32 %v2161_v54, %v2158_v50  ;;  %v2201_v33 = vunpack.c.l.b16 %v2126_v40  ;;  %v2325_v39 = vunpack.c.l.b16 %v2306_v9  ;;  %v2151_v4 = vshll.u32 %v3948_v63, 16  ;;  %v3996_v50 = vld [vmem:[#allocation2 + $0x44] sm:$0x1]  ;;  %v3998_v54 = vld [vmem:[#allocation2 + $0x4c] sm:$0x1]  ;;  %v4000_v40 = vpop.f32.mrf.mxu1 }
 0x177   : > { %v2326_v14 = vunpack.c.l.b16 %v2310_v30  ;;  %v2552_v25 = vrot.slane %v2550_v1, 5  ;;  %v2567_v51 = vsel %vm3394_vm4, %v2562_v2, %v2566_v22  ;;  %v2165_v13 = vshll.u32 %v3952_v36, 16  ;;  %v2081_v0 = vld [vmem:[#allocation2 + $0x38] sm:$0xf]  ;;  %v2664_v30 = vld [vmem:[#allocation2 + $0x20] sm:$0xe] }
 0x178   : > { %v2208_v15 = vpack.c.b16 %v2202_v34, %v2201_v33  ;;  %v2149_v48 = vrot.slane %v2148_v18, 4  ;;  %v2317_v23 = vrot.slane %v3971_v45, 5  ;;  %v2163_v61 = vrot.slane %v2162_v60, 4  ;;  %v2083_v34 = vld [vmem:[#allocation2 + $0x40] sm:$0xf] }
 0x179   : > { %v2553_v63 = vsel %vm3394_vm4, %v2548_v11, %v2552_v25  ;;  %v2569_v5 = vshrl.u32 %v2480_v6, 16  ;;  %v2572_v27 = vshll.u32 %v2480_v6, 16  ;;  %v2603_v16 = vunpack.c.l.b16 %v2567_v51  ;;  %v2665_v51 = vld [vmem:[#allocation2 + $0x28] sm:$0xe] }
 0x17a   : > { %3218 = vmatmul.msk.bf16.gmra.mxu0 %vm1752_vm15, %v3208_v44  ;;  %v2270_v44 = vld [vmem:[#allocation2 + $0x40] sm:$0xe]  ;;  %v2153_v47 = vrot.slane %v2151_v4, 5  ;;  %v3193_v56 = vrot.slane %v2269_v19, 9  ;;  %v2313_v36 = vrot.slane %v3978_v59, 5  ;;  %v2331_v37 = vpack.c.b16 %v2326_v14, %v2325_v39 }
 0x17b   : > { %v3194_v8 = vrot.slane %v2270_v44, 9  ;;  %v2167_v28 = vrot.slane %v2165_v13, 5  ;;  %v2583_v58 = vshrl.u32 %v2482_v49, 16  ;;  %v2586_v20 = vshll.u32 %v2482_v49, 16 }
 0x17c   : > { %3223 = vmatmul.msk.bf16.gmra.mxu1 %vm1752_vm15, %v2607_v43  ;;  %v2602_v55 = vunpack.c.l.b16 %v2553_v63  ;;  %v2154_v29 = vsel %vm3394_vm4, %v2149_v48, %v2153_v47  ;;  %v2571_v42 = vrot.slane %v2569_v5, 4  ;;  %v2574_v26 = vrot.slane %v2572_v27, 5 }
 0x17d   : > { %v3989_v38 = vsel %vm3768_vm14, %v3194_v8, %v2317_v23  ;;  %v2168_v24 = vsel %vm3394_vm4, %v2163_v61, %v2167_v28  ;;  %v3212_v53 = vor.u32 %v3280_v46, %v3211_v62  ;;  %v2314_v10 = vsel %vm3768_vm14, %v3193_v56, %v2313_v36  ;;  %v2666_v8 = vld [vmem:[#allocation2 + $0x30] sm:$0xe] }
 0x17e   : > { %v2608_v32 = vpack.c.b16 %v2603_v16, %v2602_v55  ;;  %v2203_v9 = vunpack.c.l.b16 %v2154_v29  ;;  %v2328_v1 = vunpack.c.l.b16 %v3989_v38  ;;  %v2585_v2 = vrot.slane %v2583_v58, 4 }
 0x17f   : > { %v2588_v43 = vrot.slane %v2586_v20, 5  ;;  %v2204_v18 = vunpack.c.l.b16 %v2168_v24  ;;  %v2592_v11 = vshll.u32 %v3998_v54, 16  ;;  %v3226_v22 = vrot.slane %v2662_v41, 9  ;;  %v2667_v20 = vld [vmem:[#allocation2 + $0x38] sm:$0xe]  ;;  %v4025_v41 = vpop.f32.mrf.mxu1 }
 0x180   : > { %v2688_v60 = vrot.slane %v3889_v12, 5  ;;  %v2575_v44 = vor.u32 %v2574_v26, %v2571_v42  ;;  %v2578_v33 = vshll.u32 %v3996_v50, 16  ;;  %v3227_v39 = vrot.slane %v2663_v52, 9 }
 0x181   : > { %v2692_v4 = vrot.slane %v3901_v57, 5  ;;  %v2170_v6 = vshrl.u32 %v2081_v0, 16  ;;  %v2184_v14 = vshrl.u32 %v2083_v34, 16  ;;  %v3228_v13 = vrot.slane %v2664_v30, 9 }
 0x182   : > { %3184 = vmatmul.msk.bf16.gmra.mxu2 %vm1752_vm15, %v2208_v15  ;;  %v2689_v25 = vsel %vm3768_vm14, %v3226_v22, %v2688_v60  ;;  %v2589_v19 = vor.u32 %v2588_v43, %v2585_v2  ;;  %v2187_v15 = vshll.u32 %v2083_v34, 16  ;;  %v2696_v48 = vrot.slane %v3925_v7, 5 }
 0x183   : > { %3198 = vmatmul.msk.bf16.gmra.mxu3 %vm1752_vm15, %v2331_v37  ;;  %v2693_v12 = vsel %vm3768_vm14, %v3227_v39, %v2692_v4  ;;  %v2594_v23 = vrot.slane %v2592_v11, 5  ;;  %v2173_v49 = vshll.u32 %v2081_v0, 16  ;;  %v2720_v57 = vunpack.c.l.b16 %v2689_v25  ;;  %v3281_v11 = vld [vmem:[#allocation2 + $0x44] sm:$0xf0] }
 0x184   : > { %v2721_v63 = vunpack.c.l.b16 %v2693_v12  ;;  %v2576_v61 = vrot.slane %v2575_v44, 4  ;;  %v2697_v5 = vsel %vm3768_vm14, %v3228_v13, %v2696_v48  ;;  %v3229_v27 = vrot.slane %v2665_v51, 9  ;;  %v2669_v39 = vld [vmem:[#allocation2 + $0x48] sm:$0xe] }
 0x185   : > { %v2700_v16 = vrot.slane %v3927_v17, 5  ;;  %v2186_v47 = vrot.slane %v2184_v14, 4  ;;  %v3230_v36 = vrot.slane %v2666_v8, 9  ;;  %v2704_v7 = vrot.slane %v3960_v31, 5 }
 0x186   : > { %v4017_v56 = vpack.c.b16 %v2721_v63, %v2720_v57  ;;  %v2590_v37 = vrot.slane %v2589_v19, 4  ;;  %v2189_v46 = vrot.slane %v2187_v15, 5  ;;  %v2722_v58 = vunpack.c.l.b16 %v2697_v5 }
 0x187   : > { %v2701_v28 = vsel %vm3768_vm14, %v3229_v27, %v2700_v16  ;;  %v2705_v29 = vsel %vm3768_vm14, %v3230_v36, %v2704_v7  ;;  %v3231_v17 = vrot.slane %v2667_v20, 9  ;;  %v2708_v38 = vrot.slane %v3955_v3, 5  ;;  %v4043_v12 = vpop.f32.mrf.mxu1 }
 0x188   : > { %v2723_v55 = vunpack.c.l.b16 %v2701_v28  ;;  %v2327_v62 = vunpack.c.l.b16 %v2314_v10  ;;  %v2172_v24 = vrot.slane %v2170_v6, 4  ;;  %v2175_v42 = vrot.slane %v2173_v49, 5 }
 0x189   : > { %v2209_v31 = vpack.c.b16 %v2204_v18, %v2203_v9  ;;  %v2580_v26 = vrot.slane %v2578_v33, 5  ;;  %v2190_v0 = vor.u32 %v2189_v46, %v2186_v47  ;;  %v2724_v2 = vunpack.c.l.b16 %v2705_v29  ;;  %v3215_v18 = vld [vmem:[#allocation2 + $0x40] sm:$0xf] }
 0x18a   : > { %3219 = vmatmul.msk.bf16.gmra.mxu0 %vm1752_vm15, %v3212_v53  ;;  %v2729_v52 = vpack.c.b16 %v2723_v55, %v2722_v58  ;;  %v2709_v53 = vsel %vm3768_vm14, %v3231_v17, %v2708_v38  ;;  %v2595_v10 = vsel %vm3394_vm4, %v2590_v37, %v2594_v23  ;;  %v2176_v9 = vor.u32 %v2175_v42, %v2172_v24  ;;  %v2668_v33 = vld [vmem:[#allocation2 + $0x40] sm:$0xe] }
 0x18b   : > { %v2725_v43 = vunpack.c.l.b16 %v2709_v53  ;;  %v2581_v3 = vsel %vm3394_vm4, %v2576_v61, %v2580_v26  ;;  %v2193_v34 = vshll.u32 %v3971_v45, 16  ;;  %v2605_v22 = vunpack.c.l.b16 %v2595_v10 }
 0x18c   : > { %3224 = vmatmul.msk.bf16.gmra.mxu1 %vm1752_vm15, %v2608_v32  ;;  %v2332_v32 = vpack.c.b16 %v2328_v1, %v2327_v62  ;;  %v2604_v1 = vunpack.c.l.b16 %v2581_v3  ;;  %v2179_v60 = vshll.u32 %v3978_v59, 16  ;;  %v2191_v44 = vrot.slane %v2190_v0, 4 }
 0x18d   : > { %v2730_v30 = vpack.c.b16 %v2725_v43, %v2724_v2  ;;  %v3232_v4 = vrot.slane %v2668_v33, 9  ;;  %v2712_v6 = vrot.slane %v3996_v50, 5  ;;  %v3233_v14 = vrot.slane %v2669_v39, 9 }
 0x18e   : > { %v2716_v25 = vrot.slane %v3998_v54, 5  ;;  %v3216_v51 = vor.u32 %v3281_v11, %v3215_v18  ;;  %v2177_v13 = vrot.slane %v2176_v9, 4  ;;  %v2195_v19 = vrot.slane %v2193_v34, 5 }
 0x18f   : > { %v2713_v45 = vsel %vm3768_vm14, %v3232_v4, %v2712_v6  ;;  %v2181_v59 = vrot.slane %v2179_v60, 5  ;;  %v2609_v54 = vpack.c.b16 %v2605_v22, %v2604_v1  ;;  %v4052_v61 = vpop.f32.mrf.mxu1 }
 0x190   : > { %v2717_v15 = vsel %vm3768_vm14, %v3233_v14, %v2716_v25  ;;  %v2196_v50 = vsel %vm3394_vm4, %v2191_v44, %v2195_v19  ;;  %v2726_v48 = vunpack.c.l.b16 %v2713_v45 }
 0x191   : > { %v2727_v8 = vunpack.c.l.b16 %v2717_v15  ;;  %v2182_v23 = vsel %vm3394_vm4, %v2177_v13, %v2181_v59  ;;  %v2206_v57 = vunpack.c.l.b16 %v2196_v50 }
 0x192   : > { %3185 = vmatmul.msk.bf16.gmra.mxu2 %vm1752_vm15, %v2209_v31  ;;  %v2205_v21 = vunpack.c.l.b16 %v2182_v23 }
 0x193   : > { %3199 = vmatmul.msk.bf16.gmra.mxu3 %vm1752_vm15, %v2332_v32  ;;  %v2731_v49 = vpack.c.b16 %v2727_v8, %v2726_v48 }
 0x194   : > { %v2210_v63 = vpack.c.b16 %v2206_v57, %v2205_v21 }
 0x197   : > { %v4054_v5 = vpop.f32.mrf.mxu1 }
 0x19a   : > { %3220 = vmatmul.msk.bf16.gmra.mxu0 %vm1752_vm15, %v3216_v51 }
 0x19c   : > { %3225 = vmatmul.msk.bf16.gmra.mxu1 %vm1752_vm15, %v2609_v54 }
 0x19f   : > { %v4058_v16 = vpop.f32.mrf.mxu1 }
 0x1a2   : > { %3186 = vmatmul.msk.bf16.gmra.mxu2 %vm1752_vm15, %v2210_v63 }
 0x1a6   : > { %v1842_v37 = vpop.f32.mrf.mxu3  ;;  %v1959_v28 = vpop.f32.mrf.mxu0 }
 0x1a7   : > { %v4060_v47 = vpop.f32.mrf.mxu1 }
 0x1ae   : > { %v1961_v55 = vpop.f32.mrf.mxu0 }
 0x1af   : > { %v4063_v7 = vpop.f32.mrf.mxu1 }
 0x1b2   : > { %3235 = vmatmul.msk.bf16.vlgmr.msra.gmra.mxu2 %vm1752_vm15, %v4017_v56  ;;  %v1844_v56 = vpop.f32.mrf.mxu3 }
 0x1b5   : > { %v1778_v27 = vpop.f32.mrf.mxu2 }
 0x1b6   : > { %v1964_v62 = vpop.f32.mrf.mxu0  ;;  %v1843_v14 = vadd.f32 %v1842_v37, %v1778_v27 }
 0x1b7   : > { %v2041_v58 = vpop.f32.mrf.mxu1 }
 0x1b8   : > { %v1979_v51 = vadd.f32 %v1959_v28, %v1843_v14 }
 0x1ba   : > { %v1847_v38 = vpop.f32.mrf.mxu3  ;;  %v2061_v15 = vadd.f32 %v2041_v58, %v1979_v51 }
 0x1bd   : > { %v1780_v35 = vpop.f32.mrf.mxu2 }
 0x1be   : > { %v1845_v45 = vadd.f32 %v1844_v56, %v1780_v35  ;;  %v4112_v35 = vld [vmem:[%s4195_s6] ss:$0 sm:$0xff] }
 0x1bf   : > { %v2043_v17 = vpop.f32.mrf.mxu1 }
 0x1c0   : > { %v1980_v48 = vadd.f32 %v1961_v55, %v1845_v45  ;;  %v4117_v55 = vld [vmem:[%s4193_s4] ss:$0 sm:$0xff] }
 0x1c2   : > { %3236 = vmatmul.msk.bf16.gmra.mxu2 %vm1752_vm15, %v2729_v52  ;;  %v1849_v31 = vpop.f32.mrf.mxu3  ;;  %v1966_v52 = vpop.f32.mrf.mxu0  ;;  %v2062_v57 = vadd.f32 %v2043_v17, %v1980_v48  ;;  %v1592_v48 = vadd.f32 %v4112_v35, %v4025_v41 }
 0x1c5   : > { %v1783_v36 = vpop.f32.mrf.mxu2 }
 0x1c7   : > { %v2046_v42 = vpop.f32.mrf.mxu1 }
 0x1ca   : > { %v1852_v32 = vpop.f32.mrf.mxu3  ;;  %v4079_v2 = vpop.f32.mrf.mxu0 }
 0x1cd   : > { %v4065_v46 = vpop.f32.mrf.mxu2 }
 0x1cf   : > { %v4077_v53 = vpop.f32.mrf.mxu1 }
 0x1d2   : > { %3237 = vmatmul.msk.bf16.gmra.mxu2 %vm1752_vm15, %v2730_v30  ;;  %v4083_v10 = vpop.f32.mrf.mxu3  ;;  %v4085_v9 = vpop.f32.mrf.mxu0 }
 0x1d5   : > { %v4068_v20 = vpop.f32.mrf.mxu2 }
 0x1d7   : > { %v4081_v43 = vpop.f32.mrf.mxu1 }
 0x1da   : > { %v4089_v18 = vpop.f32.mrf.mxu3  ;;  %v4091_v11 = vpop.f32.mrf.mxu0 }
 0x1dd   : > { %v4070_v29 = vpop.f32.mrf.mxu2 }
 0x1df   : > { %v4087_v30 = vpop.f32.mrf.mxu1 }
 0x1e2   : > { %3238 = vmatmul.msk.bf16.gmra.mxu2 %vm1752_vm15, %v2731_v49  ;;  %v4095_v60 = vpop.f32.mrf.mxu3  ;;  %v4099_v33 = vpop.f32.mrf.mxu0  ;;  %v1848_v49 = vadd.f32 %v1847_v38, %v1783_v36  ;;  %v1850_v38 = vadd.f32 %v1849_v31, %v4065_v46 }
 0x1e4   : > { %v1981_v28 = vadd.f32 %v1964_v62, %v1848_v49  ;;  %v1590_v62 = vadd.f32 %v4112_v35, %v4000_v40  ;;  %v1853_v40 = vadd.f32 %v1852_v32, %v4068_v20 }
 0x1e5   : > { %v4073_v24 = vpop.f32.mrf.mxu2 }
 0x1e7   : > { %v4093_v22 = vpop.f32.mrf.mxu1 }
 0x1ea   : > { %v2357_v4 = vpop.f32.mrf.mxu3  ;;  %v2440_v25 = vpop.f32.mrf.mxu0 }
 0x1ed   : > { %v4075_v26 = vpop.f32.mrf.mxu2 }
 0x1ef   : > { %v4101_v39 = vpop.f32.mrf.mxu1 }
 0x1f2   : > { %v2359_v59 = vpop.f32.mrf.mxu3  ;;  %v2442_v8 = vpop.f32.mrf.mxu0 }
 0x1f5   : > { %v2235_v0 = vpop.f32.mrf.mxu2 }
 0x1f6   : > { %v2255_v50 = vadd.f32 %v2235_v0, %v2061_v15  ;;  %v2063_v0 = vadd.f32 %v2046_v42, %v1981_v28  ;;  %v1855_v28 = vadd.f32 %v4083_v10, %v4070_v29 }
 0x1f7   : > { %v2634_v13 = vpop.f32.mrf.mxu1 }
 0x1f8   : > { %v2377_v54 = vadd.f32 %v2357_v4, %v2255_v50 }
 0x1fa   : > { %v2460_v27 = vadd.f32 %v2440_v25, %v2377_v54  ;;  %v2362_v37 = vpop.f32.mrf.mxu3  ;;  %v2445_v36 = vpop.f32.mrf.mxu0 }
 0x1fc   : > { %v2654_v56 = vadd.f32 %v2634_v13, %v2460_v27  ;;  %v1982_v13 = vadd.f32 %v1966_v52, %v1850_v38  ;;  %v1984_v38 = vadd.f32 %v4085_v9, %v1855_v28 }
 0x1fd   : > { %v2237_v3 = vpop.f32.mrf.mxu2 }
 0x1fe   : > { %v2256_v63 = vadd.f32 %v2237_v3, %v2062_v57  ;;  %v1983_v57 = vadd.f32 %v4079_v2, %v1853_v40  ;;  %v1600_v40 = vadd.f32 %v4112_v35, %v4054_v5 }
 0x1ff   : > { %v2636_v21 = vpop.f32.mrf.mxu1 }
 0x200   : > { %v2378_v58 = vadd.f32 %v2359_v59, %v2256_v63 }
 0x202   : > { %v2461_v25 = vadd.f32 %v2442_v8, %v2378_v58  ;;  %v2364_v15 = vpop.f32.mrf.mxu3  ;;  %v2447_v52 = vpop.f32.mrf.mxu0  ;;  %v2065_v58 = vadd.f32 %v4081_v43, %v1983_v57 }
 0x204   : > { %v2655_v31 = vadd.f32 %v2636_v21, %v2461_v25  ;;  %v1597_v25 = vadd.f32 %v4112_v35, %v4052_v61 }
 0x205   : > { %v2240_v34 = vpop.f32.mrf.mxu2 }
 0x206   : > { %v2257_v4 = vadd.f32 %v2240_v34, %v2063_v0  ;;  %v2064_v34 = vadd.f32 %v4077_v53, %v1982_v13 }
 0x207   : > { %v2639_v51 = vpop.f32.mrf.mxu1 }
 0x208   : > { %v2379_v46 = vadd.f32 %v2362_v37, %v2257_v4  ;;  %v1858_v4 = vadd.f32 %v4089_v18, %v4073_v24 }
 0x20a   : > { %v2462_v49 = vadd.f32 %v2445_v36, %v2379_v46  ;;  %v2367_v53 = vpop.f32.mrf.mxu3 }
 0x20c   : > { %v2656_v32 = vadd.f32 %v2639_v51, %v2462_v49 }
 0x20d   : > { %v2242_v1 = vpop.f32.mrf.mxu2 }
 0x20e   : > { %v2258_v8 = vadd.f32 %v2242_v1, %v2064_v34  ;;  %v1595_v1 = vadd.f32 %v4112_v35, %v4043_v12 }
 0x20f   : > { %v2641_v63 = vpop.f32.mrf.mxu1 }
 0x210   : > { %v2380_v27 = vadd.f32 %v2364_v15, %v2258_v8 }
 0x212   : > { %v2463_v36 = vadd.f32 %v2447_v52, %v2380_v27 }
 0x214   : > { %v2657_v10 = vadd.f32 %v2641_v63, %v2463_v36 }
 0x215   : > { %v4097_v44 = vpop.f32.mrf.mxu2 }
 0x216   : > { %v2259_v2 = vadd.f32 %v4097_v44, %v2065_v58  ;;  %v2369_v44 = vpop.f32.mrf.mxu3 }
 0x217   : > { %v2644_v43 = vpop.f32.mrf.mxu1 }
 0x21d   : > { %v4103_v6 = vpop.f32.mrf.mxu2 }
 0x21e   : > { %v2372_v52 = vpop.f32.mrf.mxu3 }
 0x225   : > { %v4105_v19 = vpop.f32.mrf.mxu2 }
 0x22d   : > { %v4107_v23 = vpop.f32.mrf.mxu2 }
 0x235   : > { %v2756_v17 = vpop.f32.mrf.mxu2 }
 0x236   : > { %v2776_v3 = vadd.f32 %v2756_v17, %v2654_v56  ;;  %v2450_v17 = vpop.f32.mrf.mxu0 }
 0x238   : > { %v2788_v14 = vadd.f32 %v4117_v55, %v2776_v3  ;;  %v2381_v3 = vadd.f32 %v2367_v53, %v2259_v2 }
 0x23a   : > { %v2796_v45 = vadd.f32 %v2788_v14, %v1590_v62  ;;  %v2066_v14 = vadd.f32 %v4087_v30, %v1984_v38  ;;  %v2464_v13 = vadd.f32 %v2450_v17, %v2381_v3  ;;  %v1607_v3 = vadd.f32 %v4112_v35, %v4063_v7 }
 0x23c   : > { %v2804_v42 = vmax.f32 %v2796_v45, 0.0  ;;  %v2260_v9 = vadd.f32 %v4103_v6, %v2066_v14  ;;  %v1985_v45 = vadd.f32 %v4091_v11, %v1858_v4  ;;  %v2658_v30 = vadd.f32 %v2644_v43, %v2464_v13  ;;  %v2646_v6 = vpop.f32.mrf.mxu1 }
 0x23d   : > { %v2758_v59 = vpop.f32.mrf.mxu2 }
 0x23e   : > { %2812 = vst.msk [vmem:[%s4127_s12] sm:$0xff] %vm1752_vm15, %v2804_v42  ;;  %v2777_v50 = vadd.f32 %v2758_v59, %v2655_v31  ;;  %v2452_v46 = vpop.f32.mrf.mxu0  ;;  %v2382_v24 = vadd.f32 %v2369_v44, %v2260_v9  ;;  %v1860_v31 = vadd.f32 %v4095_v60, %v4075_v26  ;;  %v2067_v59 = vadd.f32 %v4093_v22, %v1985_v45 }
 0x240   : > { %v2789_v54 = vadd.f32 %v4117_v55, %v2777_v50  ;;  %v2261_v11 = vadd.f32 %v4105_v19, %v2067_v59  ;;  %v2465_v50 = vadd.f32 %v2452_v46, %v2382_v24  ;;  %v1602_v19 = vadd.f32 %v4112_v35, %v4058_v16 }
 0x241   : > { %v1605_v16 = vadd.f32 %v4112_v35, %v4060_v47 }
 0x242   : > { %v2797_v21 = vadd.f32 %v2789_v54, %v1592_v48  ;;  %v1986_v48 = vadd.f32 %v4099_v33, %v1860_v31  ;;  %v2383_v26 = vadd.f32 %v2372_v52, %v2261_v11  ;;  %v2659_v22 = vadd.f32 %v2646_v6, %v2465_v50 }
 0x244   : > { %v2805_v20 = vmax.f32 %v2797_v21, 0.0  ;;  %v2068_v57 = vadd.f32 %v4101_v39, %v1986_v48  ;;  %v2649_v27 = vpop.f32.mrf.mxu1 }
 0x245   : > { %v2761_v37 = vpop.f32.mrf.mxu2 }
 0x246   : > { %2813 = vst.msk [vmem:[%s4127_s12 + $0x8] sm:$0xff] %vm1752_vm15, %v2805_v20  ;;  %v2778_v41 = vadd.f32 %v2761_v37, %v2656_v32  ;;  %v2455_v54 = vpop.f32.mrf.mxu0  ;;  %v2262_v21 = vadd.f32 %v4107_v23, %v2068_v57  ;;  %v2374_v32 = vpop.f32.mrf.mxu3 }
 0x247   : > { %v2466_v33 = vadd.f32 %v2455_v54, %v2383_v26 }
 0x248   : > { %v2790_v56 = vadd.f32 %v4117_v55, %v2778_v41  ;;  %v2384_v53 = vadd.f32 %v2374_v32, %v2262_v21 }
 0x249   : > { %v2660_v28 = vadd.f32 %v2649_v27, %v2466_v33 }
 0x24a   : > { %v2798_v0 = vadd.f32 %v2790_v56, %v1595_v1 }
 0x24c   : > { %v2806_v29 = vmax.f32 %v2798_v0, 0.0  ;;  %v2651_v56 = vpop.f32.mrf.mxu1 }
 0x24d   : > { %v2763_v62 = vpop.f32.mrf.mxu2 }
 0x24e   : > { %2814 = vst.msk [vmem:[%s4127_s12 + $0x10] sm:$0xff] %vm1752_vm15, %v2806_v29  ;;  %v2779_v12 = vadd.f32 %v2763_v62, %v2657_v10  ;;  %v2457_v41 = vpop.f32.mrf.mxu0 }
 0x24f   : > { %v2467_v1 = vadd.f32 %v2457_v41, %v2384_v53 }
 0x250   : > { %v2791_v51 = vadd.f32 %v4117_v55, %v2779_v12 }
 0x251   : > { %v2661_v17 = vadd.f32 %v2651_v56, %v2467_v1 }
 0x252   : > { %v2799_v15 = vadd.f32 %v2791_v51, %v1597_v25 }
 0x254   : > { %v2807_v18 = vmax.f32 %v2799_v15, 0.0 }
 0x255   : > { %v2766_v42 = vpop.f32.mrf.mxu2 }
 0x256   : > { %2815 = vst.msk [vmem:[%s4127_s12 + $0x18] sm:$0xff] %vm1752_vm15, %v2807_v18  ;;  %v2780_v61 = vadd.f32 %v2766_v42, %v2658_v30 }
 0x258   : > { %v2792_v34 = vadd.f32 %v4117_v55, %v2780_v61 }
 0x25a   : > { %v2800_v8 = vadd.f32 %v2792_v34, %v1600_v40 }
 0x25c   : > { %v2808_v60 = vmax.f32 %v2800_v8, 0.0 }
 0x25d   : > { %v2768_v49 = vpop.f32.mrf.mxu2 }
 0x25e   : > { %2816 = vst.msk [vmem:[%s4127_s12 + $0x20] sm:$0xff] %vm1752_vm15, %v2808_v60  ;;  %v2781_v5 = vadd.f32 %v2768_v49, %v2659_v22 }
 0x260   : > { %v2793_v63 = vadd.f32 %v4117_v55, %v2781_v5 }
 0x262   : > { %v2801_v20 = vadd.f32 %v2793_v63, %v1602_v19 }
 0x264   : > { %v2809_v37 = vmax.f32 %v2801_v20, 0.0 }
 0x265   : > { %v2771_v58 = vpop.f32.mrf.mxu2 }
 0x266   : > { %2817 = vst.msk [vmem:[%s4127_s12 + $0x28] sm:$0xff] %vm1752_vm15, %v2809_v37  ;;  %v2782_v39 = vadd.f32 %v2771_v58, %v2660_v28 }
 0x268   : > { %v2794_v23 = vadd.f32 %v4117_v55, %v2782_v39 }
 0x26a   : > { %v2802_v2 = vadd.f32 %v2794_v23, %v1605_v16 }
 0x26c   : > { %v2810_v36 = vmax.f32 %v2802_v2, 0.0 }
 0x26d   : > { %v2773_v38 = vpop.f32.mrf.mxu2 }
 0x26e   : > { %2818 = vst.msk [vmem:[%s4127_s12 + $0x30] sm:$0xff] %vm1752_vm15, %v2810_v36  ;;  %v2783_v0 = vadd.f32 %v2773_v38, %v2661_v17 }
 0x270   : > { %v2795_v29 = vadd.f32 %v4117_v55, %v2783_v0 }
 0x272   : > { %v2803_v10 = vadd.f32 %v2795_v29, %v1607_v3 }
 0x274   : > { %v2811_v43 = vmax.f32 %v2803_v10, 0.0 }
 0x276   : > { %2819 = vst.msk [vmem:[%s4127_s12 + $0x38] sm:$0xff] %vm1752_vm15, %v2811_v43 }
 0x277 PF: > { %s17_s24 = sadd.s32 1, %s3304_s24  }
 0x278   : > { %p14_p4 = scmp.ge.s32.totalorder %s17_s24, 4  }
 0x27a   :  { %16 = sbr.rel (!%p14_p4) target bundleno = 1 (0x1), region = 101 }

</bundles_post_ra>
